<compile_context>
chip_gen: v5e
topology: v5e:2x2
jax: 0.10.0
libtpu: 0.0.40
codegen_flags: <defaults>
</compile_context>

<pallas_src>
import functools

import jax
import jax.numpy as jnp
from jax.experimental import pallas as pl
from jax.experimental.pallas import tpu as pltpu

LRELU_SLOPE = 0.2
IN_EPS = 1e-5
KSIZE = 4
LANE = 128
FUSED_VMEM_BUDGET = 12 * 1024 * 1024  # per-layer double-buffered block budget


def _round_up(x, m):
    return (x + m - 1) // m * m


# ----------------------------- Pallas kernels ------------------------------ #

def _conv_fused_kernel(a_ref, w_ref, b_ref, g_ref, bt_ref, o_ref, *,
                       fuse_in, apply_lrelu, hw_real):
    """One image x one Cout tile: (HWp,K) @ (K,TN) + bias [+ InstanceNorm] [+ LReLU].

    Zero-padded rows of A (and zero bias for IN layers) keep padded rows at 0,
    so single-pass stats over all rows divided by hw_real are exact.
    """
    acc = jnp.dot(a_ref[0], w_ref[...], preferred_element_type=jnp.float32)
    acc = acc + b_ref[...]                       # (1, TN) broadcasts over rows
    if fuse_in:
        inv_hw = 1.0 / hw_real
        s = jnp.sum(acc, axis=0, keepdims=True)
        ss = jnp.sum(acc * acc, axis=0, keepdims=True)
        mean = s * inv_hw
        var = jnp.maximum(ss * inv_hw - mean * mean, 0.0)   # biased var (PyTorch IN)
        inv = jax.lax.rsqrt(var + IN_EPS)
        acc = (acc - mean) * inv * g_ref[...] + bt_ref[...]
    if apply_lrelu:
        acc = jnp.maximum(acc, LRELU_SLOPE * acc)
    o_ref[0] = acc.astype(o_ref.dtype)


def _conv_tiled_kernel(a_ref, w_ref, b_ref, o_ref, acc_ref, *, apply_lrelu):
    """Fallback tiled conv-as-matmul. Grid = (img, hw_tile, cout_tile, k_tile)."""
    kk = pl.program_id(3)

    @pl.when(kk == 0)
    def _():
        acc_ref[...] = jnp.zeros_like(acc_ref)

    acc_ref[...] += jnp.dot(a_ref[0], w_ref[...],
                            preferred_element_type=jnp.float32)

    @pl.when(kk == pl.num_programs(3) - 1)
    def _():
        acc = acc_ref[...] + b_ref[...]
        if apply_lrelu:
            acc = jnp.maximum(acc, LRELU_SLOPE * acc)
        o_ref[0] = acc.astype(o_ref.dtype)


def _inorm_lrelu_kernel(x_ref, g_ref, b_ref, o_ref, *, hw_real):
    """Fallback InstanceNorm(affine)+LeakyReLU over one image / one channel tile."""
    x = x_ref[0].astype(jnp.float32)
    inv_hw = 1.0 / hw_real
    s = jnp.sum(x, axis=0, keepdims=True)
    ss = jnp.sum(x * x, axis=0, keepdims=True)
    mean = s * inv_hw
    var = jnp.maximum(ss * inv_hw - mean * mean, 0.0)
    inv = jax.lax.rsqrt(var + IN_EPS)
    y = (x - mean) * inv * g_ref[...] + b_ref[...]
    y = jnp.maximum(y, LRELU_SLOPE * y)
    o_ref[0] = y.astype(o_ref.dtype)


# ------------------------------ JAX glue ----------------------------------- #

def _im2col(xp, stride):
    """xp: reflect-padded NHWC (bf16). Returns (N, Ho, Wo, 16*C), (kh, kw, c) order."""
    n, hp, wp, c = xp.shape
    ho = (hp - KSIZE) // stride + 1
    wo = (wp - KSIZE) // stride + 1
    cols = []
    for kh in range(KSIZE):
        for kw in range(KSIZE):
            cols.append(xp[:, kh:kh + stride * (ho - 1) + 1:stride,
                              kw:kw + stride * (wo - 1) + 1:stride, :])
    cols = jnp.stack(cols, axis=3)                      # (N, Ho, Wo, 16, C)
    return cols.reshape(n, ho, wo, KSIZE * KSIZE * c), ho, wo


def _conv_fused(a, arrs, kind, hw, hw_pad, k_pad, cout_pad, tn, out_dtype):
    """Per-image single-K-block conv with fused bias / IN / LeakyReLU epilogue."""
    n = a.shape[0]
    kernel = functools.partial(
        _conv_fused_kernel,
        fuse_in=(kind == "block"),
        apply_lrelu=(kind != "final"),
        hw_real=float(hw))
    return pl.pallas_call(
        kernel,
        out_shape=jax.ShapeDtypeStruct((n, hw_pad, cout_pad), out_dtype),
        grid_spec=pltpu.PrefetchScalarGridSpec(
            num_scalar_prefetch=0,
            grid=(n, cout_pad // tn),
            in_specs=[
                pl.BlockSpec((1, hw_pad, k_pad), lambda i, j: (i, 0, 0)),
                pl.BlockSpec((k_pad, tn), lambda i, j: (0, j)),
                pl.BlockSpec((1, tn), lambda i, j: (0, j)),
                pl.BlockSpec((1, tn), lambda i, j: (0, j)),
                pl.BlockSpec((1, tn), lambda i, j: (0, j)),
            ],
            out_specs=pl.BlockSpec((1, hw_pad, tn), lambda i, j: (i, 0, j)),
        ),
        compiler_params=pltpu.CompilerParams(
            dimension_semantics=("parallel", "parallel")),
    )(a, arrs["w"], arrs["b"], arrs["gamma"], arrs["beta"])


def _conv_tiled(a, arrs, kind, hw, hw_pad, k_pad, cout_pad, tn, out_dtype):
    """Fallback for blocks too large to fuse per-image (production-sized images)."""
    n = a.shape[0]
    t_hw = min(hw_pad, 256)
    hw_pad2 = _round_up(hw_pad, t_hw)
    if hw_pad2 != hw_pad:
        a = jnp.pad(a, ((0, 0), (0, hw_pad2 - hw_pad), (0, 0)))
    t_k = max(d for d in (512, 256, 128) if k_pad % d == 0)
    apply_lrelu = (kind == "input")
    conv_dtype = jnp.bfloat16 if kind == "block" else out_dtype

    conv_out = pl.pallas_call(
        functools.partial(_conv_tiled_kernel, apply_lrelu=apply_lrelu),
        out_shape=jax.ShapeDtypeStruct((n, hw_pad2, cout_pad), conv_dtype),
        grid_spec=pltpu.PrefetchScalarGridSpec(
            num_scalar_prefetch=0,
            grid=(n, hw_pad2 // t_hw, cout_pad // tn, k_pad // t_k),
            in_specs=[
                pl.BlockSpec((1, t_hw, t_k), lambda i, m, j, kk: (i, m, kk)),
                pl.BlockSpec((t_k, tn), lambda i, m, j, kk: (kk, j)),
                pl.BlockSpec((1, tn), lambda i, m, j, kk: (0, j)),
            ],
            out_specs=pl.BlockSpec((1, t_hw, tn), lambda i, m, j, kk: (i, m, j)),
            scratch_shapes=[pltpu.VMEM((t_hw, tn), jnp.float32)],
        ),
        compiler_params=pltpu.CompilerParams(
            dimension_semantics=("parallel", "parallel", "parallel", "arbitrary")),
    )(a, arrs["w"], arrs["b"])

    if kind != "block":
        return conv_out

    # Separate InstanceNorm + LeakyReLU (padded rows are exactly 0: no bias).
    # TODO(synk): chunk HW with a two-pass/scratch reduction for extremely large
    # images so the per-image block fits v7x's 64 MiB VMEM.
    return pl.pallas_call(
        functools.partial(_inorm_lrelu_kernel, hw_real=float(hw)),
        out_shape=jax.ShapeDtypeStruct((n, hw_pad2, cout_pad), out_dtype),
        grid_spec=pltpu.PrefetchScalarGridSpec(
            num_scalar_prefetch=0,
            grid=(n, cout_pad // tn),
            in_specs=[
                pl.BlockSpec((1, hw_pad2, tn), lambda i, j: (i, 0, j)),
                pl.BlockSpec((1, tn), lambda i, j: (0, j)),
                pl.BlockSpec((1, tn), lambda i, j: (0, j)),
            ],
            out_specs=pl.BlockSpec((1, hw_pad2, tn), lambda i, j: (i, 0, j)),
        ),
        compiler_params=pltpu.CompilerParams(
            dimension_semantics=("parallel", "parallel")),
    )(conv_out, arrs["gamma"], arrs["beta"])


def conv_layer(x_nhwc, arrs, spec):
    """Conv2d(k=4, pad=1, reflect) [+ bias] [+ InstanceNorm] [+ LeakyReLU]."""
    stride, cin, kind = spec["stride"], spec["cin"], spec["kind"]
    k_pad, cout_pad = spec["k_pad"], spec["cout_pad"]
    n = x_nhwc.shape[0]

    # Slice to REAL channels before im2col: no contraction over lane padding.
    x = x_nhwc[..., :cin].astype(jnp.bfloat16)
    xp = jnp.pad(x, ((0, 0), (1, 1), (1, 1), (0, 0)), mode="reflect")
    cols, ho, wo = _im2col(xp, stride)
    hw = ho * wo
    k = KSIZE * KSIZE * cin
    hw_pad = _round_up(hw, 8)

    a = jnp.pad(cols.reshape(n, hw, k),
                ((0, 0), (0, hw_pad - hw), (0, k_pad - k)))      # bf16, zero-padded

    out_dtype = jnp.float32 if kind == "final" else jnp.bfloat16
    tn = 256 if cout_pad % 256 == 0 else LANE

    # Double-buffered VMEM estimate of the fused per-image blocks (bytes).
    out_bytes = 4 if kind == "final" else 2
    fused_vmem = 2 * (hw_pad * k_pad * 2 + k_pad * tn * 2 + hw_pad * tn * out_bytes)
    if fused_vmem <= FUSED_VMEM_BUDGET:
        out = _conv_fused(a, arrs, kind, hw, hw_pad, k_pad, cout_pad, tn, out_dtype)
    else:
        out = _conv_tiled(a, arrs, kind, hw, hw_pad, k_pad, cout_pad, tn, out_dtype)

    return out[:, :hw, :].reshape(n, ho, wo, cout_pad)


# --------------------------- Model definition ------------------------------ #

def _prep_conv(w_oihw, bias, gamma, beta):
    """Precompute lane-dense (K_pad, Cout_pad) bf16 weight + (1, Cout_pad) f32 vecs."""
    cout, cin = w_oihw.shape[0], w_oihw.shape[1]
    k = KSIZE * KSIZE * cin
    k_pad = _round_up(k, LANE)
    cout_pad = _round_up(cout, LANE)

    wm = jnp.transpose(w_oihw, (2, 3, 1, 0)).reshape(k, cout).astype(jnp.float32)
    wm = jnp.pad(wm, ((0, k_pad - k), (0, cout_pad - cout))).astype(jnp.bfloat16)

    def vec(v):
        if v is None:
            return jnp.zeros((1, cout_pad), jnp.float32)
        return jnp.pad(v.astype(jnp.float32), (0, cout_pad - cout)).reshape(1, cout_pad)

    return {"w": wm, "b": vec(bias), "gamma": vec(gamma), "beta": vec(beta)}


def init_and_prepare(key, in_ch, features):
    """Returns (prep: pytree of arrays, arch: static tuple of layer descriptors)."""
    n_layers = len(features) + 1
    keys = jax.random.split(key, n_layers + 2)

    def conv_w(k, cout, cin):
        fan_in = cin * KSIZE * KSIZE
        return jax.random.normal(k, (cout, cin, KSIZE, KSIZE), jnp.float32) / jnp.sqrt(fan_in)

    prep, arch = [], []

    # input block: conv(stride 2, bias) + LeakyReLU
    cin0 = in_ch * 2
    w = conv_w(keys[0], features[0], cin0)
    b = 0.01 * jax.random.normal(keys[1], (features[0],), jnp.float32)
    prep.append(_prep_conv(w, b, None, None))
    arch.append(dict(kind="input", stride=2, cin=cin0,
                     k_pad=_round_up(KSIZE * KSIZE * cin0, LANE),
                     cout_pad=_round_up(features[0], LANE)))

    # ConvBlocks: conv(no bias) -> InstanceNorm(affine) -> LeakyReLU
    prev = features[0]
    ki = 2
    for feat in features[1:]:
        stride = 1 if feat == features[-1] else 2
        w = conv_w(keys[ki], feat, prev)
        ki += 1
        prep.append(_prep_conv(w, None, jnp.ones((feat,), jnp.float32),
                               jnp.zeros((feat,), jnp.float32)))
        arch.append(dict(kind="block", stride=stride, cin=prev,
                         k_pad=_round_up(KSIZE * KSIZE * prev, LANE),
                         cout_pad=_round_up(feat, LANE)))
        prev = feat

    # final conv: prev -> 1 channel, stride 1, bias, no activation
    w = conv_w(keys[ki], 1, prev)
    b = 0.01 * jax.random.normal(keys[ki + 1], (1,), jnp.float32)
    prep.append(_prep_conv(w, b, None, None))
    arch.append(dict(kind="final", stride=1, cin=prev,
                     k_pad=_round_up(KSIZE * KSIZE * prev, LANE),
                     cout_pad=LANE))

    return prep, tuple(arch)


def discriminator_forward(prep, x_nchw, y_nchw, arch):
    x = jnp.transpose(x_nchw, (0, 2, 3, 1))
    y = jnp.transpose(y_nchw, (0, 2, 3, 1))
    h = jnp.concatenate([x, y], axis=-1)                 # channel concat

    for arrs, spec in zip(prep, arch):
        h = conv_layer(h, arrs, spec)

    feats = h[..., :1].astype(jnp.float32)               # real channel of final conv
    gap = jnp.mean(feats, axis=(1, 2))                   # AdaptiveAvgPool2d(1) -> (N, 1)
    feats_nchw = jnp.transpose(feats, (0, 3, 1, 2))      # back to NCHW like PyTorch
    return gap, feats_nchw


# --------------------------------- Main ------------------------------------ #

if __name__ == "__main__":
    key = jax.random.PRNGKey(0)
    kx, ky, kp = jax.random.split(key, 3)

    # Small shapes consistent with the module (scaled-down feature widths).
    N, in_ch, H, W = 2, 3, 32, 32
    features = [16, 32, 64, 128]      # distinct values preserve the (2, 2, 1) stride pattern

    x = jax.random.normal(kx, (N, in_ch, H, W), jnp.float32)
    y = jax.random.normal(ky, (N, in_ch, H, W), jnp.float32)
    prep, arch = init_and_prepare(kp, in_ch, features)

    fwd = jax.jit(functools.partial(discriminator_forward, arch=arch))
    gap_out, feats = fwd(prep, x, y)
    jax.block_until_ready((gap_out, feats))

    # 32 -> 16 -> 8 -> 4 -> 3 (stride 1) -> 2 (final conv)
    assert gap_out.shape == (N, 1), gap_out.shape
    assert feats.shape == (N, 1, 2, 2), feats.shape
    assert bool(jnp.all(jnp.isfinite(gap_out))) and bool(jnp.all(jnp.isfinite(feats)))
    print("KERNEL_OK")
</pallas_src>

<mosaic_0001>
module attributes {stable_mosaic.version = 11 : i64} {
  func.func @_conv_fused_kernel(%arg0: i32, %arg1: i32, %arg2: memref<1x256x128xbf16, #tpu.memory_space<vmem>>, %arg3: memref<128x128xbf16, #tpu.memory_space<vmem>>, %arg4: memref<1x128xf32, #tpu.memory_space<vmem>>, %arg5: memref<1x128xf32, #tpu.memory_space<vmem>>, %arg6: memref<1x128xf32, #tpu.memory_space<vmem>>, %arg7: memref<1x256x128xbf16, #tpu.memory_space<vmem>>) attributes {dimension_semantics = [#tpu.dimension_semantics<parallel>, #tpu.dimension_semantics<parallel>], iteration_bounds = array<i64: 2, 1>, scalar_prefetch = 0 : i64, scratch_operands = 0 : i64, tpu.core_type = #tpu.core_type<tc>, window_params = [{transform_indices = @transform_0, window_bounds = array<i64: 1, 256, 128>}, {transform_indices = @transform_1, window_bounds = array<i64: 128, 128>}, {transform_indices = @transform_2, window_bounds = array<i64: 1, 128>}, {transform_indices = @transform_3, window_bounds = array<i64: 1, 128>}, {transform_indices = @transform_4, window_bounds = array<i64: 1, 128>}, {transform_indices = @transform_5, window_bounds = array<i64: 1, 256, 128>}]} {
    %c0 = arith.constant 0 : index
    %c0_0 = arith.constant 0 : index
    %c0_1 = arith.constant 0 : index
    %0 = vector.load %arg2[%c0, %c0_0, %c0_1] : memref<1x256x128xbf16, #tpu.memory_space<vmem>>, vector<1x256x128xbf16>
    %1 = vector.shape_cast %0 : vector<1x256x128xbf16> to vector<256x128xbf16>
    %c0_2 = arith.constant 0 : index
    %c0_3 = arith.constant 0 : index
    %2 = vector.load %arg3[%c0_2, %c0_3] : memref<128x128xbf16, #tpu.memory_space<vmem>>, vector<128x128xbf16>
    %cst = arith.constant dense<0.000000e+00> : vector<256x128xf32>
    %3 = tpu.matmul %1, %2, %cst {dimension_numbers = #tpu.dot_dimension_numbers<[1], [0], [0], [1], [0, 0, 1, 1], [], []>} : vector<256x128xbf16>, vector<128x128xbf16>, vector<256x128xf32> -> vector<256x128xf32>
    %c0_4 = arith.constant 0 : index
    %c0_5 = arith.constant 0 : index
    %4 = vector.load %arg4[%c0_4, %c0_5] : memref<1x128xf32, #tpu.memory_space<vmem>>, vector<1x128xf32>
    %5 = vector.broadcast %4 : vector<1x128xf32> to vector<256x128xf32>
    %6 = arith.addf %3, %5 : vector<256x128xf32>
    %cst_6 = arith.constant 2.000000e-01 : f32
    %7 = vector.broadcast %cst_6 : f32 to vector<256x128xf32>
    %8 = arith.mulf %7, %6 : vector<256x128xf32>
    %9 = arith.maximumf %6, %8 : vector<256x128xf32>
    %10 = arith.truncf %9 : vector<256x128xf32> to vector<256x128xbf16>
    %c0_7 = arith.constant 0 : index
    %c0_8 = arith.constant 0 : index
    %c0_9 = arith.constant 0 : index
    %11 = vector.load %arg7[%c0_7, %c0_8, %c0_9] : memref<1x256x128xbf16, #tpu.memory_space<vmem>>, vector<1x256x128xbf16>
    %12 = vector.shape_cast %11 : vector<1x256x128xbf16> to vector<256x128xbf16>
    %13 = vector.shape_cast %10 : vector<256x128xbf16> to vector<1x256x128xbf16>
    tpu.vector_store %arg7[%c0_7, %c0_8, %c0_9], %13 {strides = array<i32>} : memref<1x256x128xbf16, #tpu.memory_space<vmem>>, vector<1x256x128xbf16>,
    return
  }
  func.func @transform_0(%arg0: i32, %arg1: i32) -> (i32, i32, i32) {
    %c0_i32 = arith.constant 0 : i32
    %c0_i32_0 = arith.constant 0 : i32
    %c0_i32_1 = arith.constant 0 : i32
    return %arg0, %c0_i32, %c0_i32_0 : i32, i32, i32
  }
  func.func @transform_1(%arg0: i32, %arg1: i32) -> (i32, i32) {
    %c0_i32 = arith.constant 0 : i32
    %c0_i32_0 = arith.constant 0 : i32
    return %c0_i32, %arg1 : i32, i32
  }
  func.func @transform_2(%arg0: i32, %arg1: i32) -> (i32, i32) {
    %c0_i32 = arith.constant 0 : i32
    %c0_i32_0 = arith.constant 0 : i32
    return %c0_i32, %arg1 : i32, i32
  }
  func.func @transform_3(%arg0: i32, %arg1: i32) -> (i32, i32) {
    %c0_i32 = arith.constant 0 : i32
    %c0_i32_0 = arith.constant 0 : i32
    return %c0_i32, %arg1 : i32, i32
  }
  func.func @transform_4(%arg0: i32, %arg1: i32) -> (i32, i32) {
    %c0_i32 = arith.constant 0 : i32
    %c0_i32_0 = arith.constant 0 : i32
    return %c0_i32, %arg1 : i32, i32
  }
  func.func @transform_5(%arg0: i32, %arg1: i32) -> (i32, i32, i32) {
    %c0_i32 = arith.constant 0 : i32
    %c0_i32_0 = arith.constant 0 : i32
    return %arg0, %c0_i32, %arg1 : i32, i32, i32
  }
}

module attributes {stable_mosaic.version = 11 : i64} {
  func.func @_conv_fused_kernel(%arg0: i32, %arg1: i32, %arg2: memref<1x64x256xbf16, #tpu.memory_space<vmem>>, %arg3: memref<256x128xbf16, #tpu.memory_space<vmem>>, %arg4: memref<1x128xf32, #tpu.memory_space<vmem>>, %arg5: memref<1x128xf32, #tpu.memory_space<vmem>>, %arg6: memref<1x128xf32, #tpu.memory_space<vmem>>, %arg7: memref<1x64x128xbf16, #tpu.memory_space<vmem>>) attributes {dimension_semantics = [#tpu.dimension_semantics<parallel>, #tpu.dimension_semantics<parallel>], iteration_bounds = array<i64: 2, 1>, scalar_prefetch = 0 : i64, scratch_operands = 0 : i64, tpu.core_type = #tpu.core_type<tc>, window_params = [{transform_indices = @transform_0, window_bounds = array<i64: 1, 64, 256>}, {transform_indices = @transform_1, window_bounds = array<i64: 256, 128>}, {transform_indices = @transform_2, window_bounds = array<i64: 1, 128>}, {transform_indices = @transform_3, window_bounds = array<i64: 1, 128>}, {transform_indices = @transform_4, window_bounds = array<i64: 1, 128>}, {transform_indices = @transform_5, window_bounds = array<i64: 1, 64, 128>}]} {
    %c0 = arith.constant 0 : index
    %c0_0 = arith.constant 0 : index
    %c0_1 = arith.constant 0 : index
    %0 = vector.load %arg2[%c0, %c0_0, %c0_1] : memref<1x64x256xbf16, #tpu.memory_space<vmem>>, vector<1x64x256xbf16>
    %1 = vector.shape_cast %0 : vector<1x64x256xbf16> to vector<64x256xbf16>
    %c0_2 = arith.constant 0 : index
    %c0_3 = arith.constant 0 : index
    %2 = vector.load %arg3[%c0_2, %c0_3] : memref<256x128xbf16, #tpu.memory_space<vmem>>, vector<256x128xbf16>
    %cst = arith.constant dense<0.000000e+00> : vector<64x128xf32>
    %3 = tpu.matmul %1, %2, %cst {dimension_numbers = #tpu.dot_dimension_numbers<[1], [0], [0], [1], [0, 0, 1, 1], [], []>} : vector<64x256xbf16>, vector<256x128xbf16>, vector<64x128xf32> -> vector<64x128xf32>
    %c0_4 = arith.constant 0 : index
    %c0_5 = arith.constant 0 : index
    %4 = vector.load %arg4[%c0_4, %c0_5] : memref<1x128xf32, #tpu.memory_space<vmem>>, vector<1x128xf32>
    %5 = vector.broadcast %4 : vector<1x128xf32> to vector<64x128xf32>
    %6 = arith.addf %3, %5 : vector<64x128xf32>
    %cst_6 = arith.constant dense<0.000000e+00> : vector<128xf32>
    %7 = vector.multi_reduction <add>, %6, %cst_6 [0] : vector<64x128xf32> to vector<128xf32>
    %8 = vector.shape_cast %7 : vector<128xf32> to vector<1x128xf32>
    %9 = arith.mulf %6, %6 : vector<64x128xf32>
    %cst_7 = arith.constant dense<0.000000e+00> : vector<128xf32>
    %10 = vector.multi_reduction <add>, %9, %cst_7 [0] : vector<64x128xf32> to vector<128xf32>
    %11 = vector.shape_cast %10 : vector<128xf32> to vector<1x128xf32>
    %cst_8 = arith.constant 1.562500e-02 : f32
    %12 = vector.broadcast %cst_8 : f32 to vector<1x128xf32>
    %13 = arith.mulf %8, %12 : vector<1x128xf32>
    %cst_9 = arith.constant 1.562500e-02 : f32
    %14 = vector.broadcast %cst_9 : f32 to vector<1x128xf32>
    %15 = arith.mulf %11, %14 : vector<1x128xf32>
    %16 = arith.mulf %13, %13 : vector<1x128xf32>
    %17 = arith.subf %15, %16 : vector<1x128xf32>
    %cst_10 = arith.constant 0.000000e+00 : f32
    %18 = vector.broadcast %cst_10 : f32 to vector<1x128xf32>
    %19 = arith.maximumf %17, %18 : vector<1x128xf32>
    %cst_11 = arith.constant 9.99999974E-6 : f32
    %20 = vector.broadcast %cst_11 : f32 to vector<1x128xf32>
    %21 = arith.addf %19, %20 : vector<1x128xf32>
    %22 = math.rsqrt %21 : vector<1x128xf32>
    %23 = vector.broadcast %13 : vector<1x128xf32> to vector<64x128xf32>
    %24 = arith.subf %6, %23 : vector<64x128xf32>
    %25 = vector.broadcast %22 : vector<1x128xf32> to vector<64x128xf32>
    %26 = arith.mulf %24, %25 : vector<64x128xf32>
    %c0_12 = arith.constant 0 : index
    %c0_13 = arith.constant 0 : index
    %27 = vector.load %arg5[%c0_12, %c0_13] : memref<1x128xf32, #tpu.memory_space<vmem>>, vector<1x128xf32>
    %28 = vector.broadcast %27 : vector<1x128xf32> to vector<64x128xf32>
    %29 = arith.mulf %26, %28 : vector<64x128xf32>
    %c0_14 = arith.constant 0 : index
    %c0_15 = arith.constant 0 : index
    %30 = vector.load %arg6[%c0_14, %c0_15] : memref<1x128xf32, #tpu.memory_space<vmem>>, vector<1x128xf32>
    %31 = vector.broadcast %30 : vector<1x128xf32> to vector<64x128xf32>
    %32 = arith.addf %29, %31 : vector<64x128xf32>
    %cst_16 = arith.constant 2.000000e-01 : f32
    %33 = vector.broadcast %cst_16 : f32 to vector<64x128xf32>
    %34 = arith.mulf %33, %32 : vector<64x128xf32>
    %35 = arith.maximumf %32, %34 : vector<64x128xf32>
    %36 = arith.truncf %35 : vector<64x128xf32> to vector<64x128xbf16>
    %c0_17 = arith.constant 0 : index
    %c0_18 = arith.constant 0 : index
    %c0_19 = arith.constant 0 : index
    %37 = vector.load %arg7[%c0_17, %c0_18, %c0_19] : memref<1x64x128xbf16, #tpu.memory_space<vmem>>, vector<1x64x128xbf16>
    %38 = vector.shape_cast %37 : vector<1x64x128xbf16> to vector<64x128xbf16>
    %39 = vector.shape_cast %36 : vector<64x128xbf16> to vector<1x64x128xbf16>
    tpu.vector_store %arg7[%c0_17, %c0_18, %c0_19], %39 {strides = array<i32>} : memref<1x64x128xbf16, #tpu.memory_space<vmem>>, vector<1x64x128xbf16>,
    return
  }
  func.func @transform_0(%arg0: i32, %arg1: i32) -> (i32, i32, i32) {
    %c0_i32 = arith.constant 0 : i32
    %c0_i32_0 = arith.constant 0 : i32
    %c0_i32_1 = arith.constant 0 : i32
    return %arg0, %c0_i32, %c0_i32_0 : i32, i32, i32
  }
  func.func @transform_1(%arg0: i32, %arg1: i32) -> (i32, i32) {
    %c0_i32 = arith.constant 0 : i32
    %c0_i32_0 = arith.constant 0 : i32
    return %c0_i32, %arg1 : i32, i32
  }
  func.func @transform_2(%arg0: i32, %arg1: i32) -> (i32, i32) {
    %c0_i32 = arith.constant 0 : i32
    %c0_i32_0 = arith.constant 0 : i32
    return %c0_i32, %arg1 : i32, i32
  }
  func.func @transform_3(%arg0: i32, %arg1: i32) -> (i32, i32) {
    %c0_i32 = arith.constant 0 : i32
    %c0_i32_0 = arith.constant 0 : i32
    return %c0_i32, %arg1 : i32, i32
  }
  func.func @transform_4(%arg0: i32, %arg1: i32) -> (i32, i32) {
    %c0_i32 = arith.constant 0 : i32
    %c0_i32_0 = arith.constant 0 : i32
    return %c0_i32, %arg1 : i32, i32
  }
  func.func @transform_5(%arg0: i32, %arg1: i32) -> (i32, i32, i32) {
    %c0_i32 = arith.constant 0 : i32
    %c0_i32_0 = arith.constant 0 : i32
    return %arg0, %c0_i32, %arg1 : i32, i32, i32
  }
}

module attributes {stable_mosaic.version = 11 : i64} {
  func.func @_conv_fused_kernel(%arg0: i32, %arg1: i32, %arg2: memref<1x16x512xbf16, #tpu.memory_space<vmem>>, %arg3: memref<512x128xbf16, #tpu.memory_space<vmem>>, %arg4: memref<1x128xf32, #tpu.memory_space<vmem>>, %arg5: memref<1x128xf32, #tpu.memory_space<vmem>>, %arg6: memref<1x128xf32, #tpu.memory_space<vmem>>, %arg7: memref<1x16x128xbf16, #tpu.memory_space<vmem>>) attributes {dimension_semantics = [#tpu.dimension_semantics<parallel>, #tpu.dimension_semantics<parallel>], iteration_bounds = array<i64: 2, 1>, scalar_prefetch = 0 : i64, scratch_operands = 0 : i64, tpu.core_type = #tpu.core_type<tc>, window_params = [{transform_indices = @transform_0, window_bounds = array<i64: 1, 16, 512>}, {transform_indices = @transform_1, window_bounds = array<i64: 512, 128>}, {transform_indices = @transform_2, window_bounds = array<i64: 1, 128>}, {transform_indices = @transform_3, window_bounds = array<i64: 1, 128>}, {transform_indices = @transform_4, window_bounds = array<i64: 1, 128>}, {transform_indices = @transform_5, window_bounds = array<i64: 1, 16, 128>}]} {
    %c0 = arith.constant 0 : index
    %c0_0 = arith.constant 0 : index
    %c0_1 = arith.constant 0 : index
    %0 = vector.load %arg2[%c0, %c0_0, %c0_1] : memref<1x16x512xbf16, #tpu.memory_space<vmem>>, vector<1x16x512xbf16>
    %1 = vector.shape_cast %0 : vector<1x16x512xbf16> to vector<16x512xbf16>
    %c0_2 = arith.constant 0 : index
    %c0_3 = arith.constant 0 : index
    %2 = vector.load %arg3[%c0_2, %c0_3] : memref<512x128xbf16, #tpu.memory_space<vmem>>, vector<512x128xbf16>
    %cst = arith.constant dense<0.000000e+00> : vector<16x128xf32>
    %3 = tpu.matmul %1, %2, %cst {dimension_numbers = #tpu.dot_dimension_numbers<[1], [0], [0], [1], [0, 0, 1, 1], [], []>} : vector<16x512xbf16>, vector<512x128xbf16>, vector<16x128xf32> -> vector<16x128xf32>
    %c0_4 = arith.constant 0 : index
    %c0_5 = arith.constant 0 : index
    %4 = vector.load %arg4[%c0_4, %c0_5] : memref<1x128xf32, #tpu.memory_space<vmem>>, vector<1x128xf32>
    %5 = vector.broadcast %4 : vector<1x128xf32> to vector<16x128xf32>
    %6 = arith.addf %3, %5 : vector<16x128xf32>
    %cst_6 = arith.constant dense<0.000000e+00> : vector<128xf32>
    %7 = vector.multi_reduction <add>, %6, %cst_6 [0] : vector<16x128xf32> to vector<128xf32>
    %8 = vector.shape_cast %7 : vector<128xf32> to vector<1x128xf32>
    %9 = arith.mulf %6, %6 : vector<16x128xf32>
    %cst_7 = arith.constant dense<0.000000e+00> : vector<128xf32>
    %10 = vector.multi_reduction <add>, %9, %cst_7 [0] : vector<16x128xf32> to vector<128xf32>
    %11 = vector.shape_cast %10 : vector<128xf32> to vector<1x128xf32>
    %cst_8 = arith.constant 6.250000e-02 : f32
    %12 = vector.broadcast %cst_8 : f32 to vector<1x128xf32>
    %13 = arith.mulf %8, %12 : vector<1x128xf32>
    %cst_9 = arith.constant 6.250000e-02 : f32
    %14 = vector.broadcast %cst_9 : f32 to vector<1x128xf32>
    %15 = arith.mulf %11, %14 : vector<1x128xf32>
    %16 = arith.mulf %13, %13 : vector<1x128xf32>
    %17 = arith.subf %15, %16 : vector<1x128xf32>
    %cst_10 = arith.constant 0.000000e+00 : f32
    %18 = vector.broadcast %cst_10 : f32 to vector<1x128xf32>
    %19 = arith.maximumf %17, %18 : vector<1x128xf32>
    %cst_11 = arith.constant 9.99999974E-6 : f32
    %20 = vector.broadcast %cst_11 : f32 to vector<1x128xf32>
    %21 = arith.addf %19, %20 : vector<1x128xf32>
    %22 = math.rsqrt %21 : vector<1x128xf32>
    %23 = vector.broadcast %13 : vector<1x128xf32> to vector<16x128xf32>
    %24 = arith.subf %6, %23 : vector<16x128xf32>
    %25 = vector.broadcast %22 : vector<1x128xf32> to vector<16x128xf32>
    %26 = arith.mulf %24, %25 : vector<16x128xf32>
    %c0_12 = arith.constant 0 : index
    %c0_13 = arith.constant 0 : index
    %27 = vector.load %arg5[%c0_12, %c0_13] : memref<1x128xf32, #tpu.memory_space<vmem>>, vector<1x128xf32>
    %28 = vector.broadcast %27 : vector<1x128xf32> to vector<16x128xf32>
    %29 = arith.mulf %26, %28 : vector<16x128xf32>
    %c0_14 = arith.constant 0 : index
    %c0_15 = arith.constant 0 : index
    %30 = vector.load %arg6[%c0_14, %c0_15] : memref<1x128xf32, #tpu.memory_space<vmem>>, vector<1x128xf32>
    %31 = vector.broadcast %30 : vector<1x128xf32> to vector<16x128xf32>
    %32 = arith.addf %29, %31 : vector<16x128xf32>
    %cst_16 = arith.constant 2.000000e-01 : f32
    %33 = vector.broadcast %cst_16 : f32 to vector<16x128xf32>
    %34 = arith.mulf %33, %32 : vector<16x128xf32>
    %35 = arith.maximumf %32, %34 : vector<16x128xf32>
    %36 = arith.truncf %35 : vector<16x128xf32> to vector<16x128xbf16>
    %c0_17 = arith.constant 0 : index
    %c0_18 = arith.constant 0 : index
    %c0_19 = arith.constant 0 : index
    %37 = vector.load %arg7[%c0_17, %c0_18, %c0_19] : memref<1x16x128xbf16, #tpu.memory_space<vmem>>, vector<1x16x128xbf16>
    %38 = vector.shape_cast %37 : vector<1x16x128xbf16> to vector<16x128xbf16>
    %39 = vector.shape_cast %36 : vector<16x128xbf16> to vector<1x16x128xbf16>
    tpu.vector_store %arg7[%c0_17, %c0_18, %c0_19], %39 {strides = array<i32>} : memref<1x16x128xbf16, #tpu.memory_space<vmem>>, vector<1x16x128xbf16>,
    return
  }
  func.func @transform_0(%arg0: i32, %arg1: i32) -> (i32, i32, i32) {
    %c0_i32 = arith.constant 0 : i32
    %c0_i32_0 = arith.constant 0 : i32
    %c0_i32_1 = arith.constant 0 : i32
    return %arg0, %c0_i32, %c0_i32_0 : i32, i32, i32
  }
  func.func @transform_1(%arg0: i32, %arg1: i32) -> (i32, i32) {
    %c0_i32 = arith.constant 0 : i32
    %c0_i32_0 = arith.constant 0 : i32
    return %c0_i32, %arg1 : i32, i32
  }
  func.func @transform_2(%arg0: i32, %arg1: i32) -> (i32, i32) {
    %c0_i32 = arith.constant 0 : i32
    %c0_i32_0 = arith.constant 0 : i32
    return %c0_i32, %arg1 : i32, i32
  }
  func.func @transform_3(%arg0: i32, %arg1: i32) -> (i32, i32) {
    %c0_i32 = arith.constant 0 : i32
    %c0_i32_0 = arith.constant 0 : i32
    return %c0_i32, %arg1 : i32, i32
  }
  func.func @transform_4(%arg0: i32, %arg1: i32) -> (i32, i32) {
    %c0_i32 = arith.constant 0 : i32
    %c0_i32_0 = arith.constant 0 : i32
    return %c0_i32, %arg1 : i32, i32
  }
  func.func @transform_5(%arg0: i32, %arg1: i32) -> (i32, i32, i32) {
    %c0_i32 = arith.constant 0 : i32
    %c0_i32_0 = arith.constant 0 : i32
    return %arg0, %c0_i32, %arg1 : i32, i32, i32
  }
}

module attributes {stable_mosaic.version = 11 : i64} {
  func.func @_conv_fused_kernel(%arg0: i32, %arg1: i32, %arg2: memref<1x16x1024xbf16, #tpu.memory_space<vmem>>, %arg3: memref<1024x128xbf16, #tpu.memory_space<vmem>>, %arg4: memref<1x128xf32, #tpu.memory_space<vmem>>, %arg5: memref<1x128xf32, #tpu.memory_space<vmem>>, %arg6: memref<1x128xf32, #tpu.memory_space<vmem>>, %arg7: memref<1x16x128xbf16, #tpu.memory_space<vmem>>) attributes {dimension_semantics = [#tpu.dimension_semantics<parallel>, #tpu.dimension_semantics<parallel>], iteration_bounds = array<i64: 2, 1>, scalar_prefetch = 0 : i64, scratch_operands = 0 : i64, tpu.core_type = #tpu.core_type<tc>, window_params = [{transform_indices = @transform_0, window_bounds = array<i64: 1, 16, 1024>}, {transform_indices = @transform_1, window_bounds = array<i64: 1024, 128>}, {transform_indices = @transform_2, window_bounds = array<i64: 1, 128>}, {transform_indices = @transform_3, window_bounds = array<i64: 1, 128>}, {transform_indices = @transform_4, window_bounds = array<i64: 1, 128>}, {transform_indices = @transform_5, window_bounds = array<i64: 1, 16, 128>}]} {
    %c0 = arith.constant 0 : index
    %c0_0 = arith.constant 0 : index
    %c0_1 = arith.constant 0 : index
    %0 = vector.load %arg2[%c0, %c0_0, %c0_1] : memref<1x16x1024xbf16, #tpu.memory_space<vmem>>, vector<1x16x1024xbf16>
    %1 = vector.shape_cast %0 : vector<1x16x1024xbf16> to vector<16x1024xbf16>
    %c0_2 = arith.constant 0 : index
    %c0_3 = arith.constant 0 : index
    %2 = vector.load %arg3[%c0_2, %c0_3] : memref<1024x128xbf16, #tpu.memory_space<vmem>>, vector<1024x128xbf16>
    %cst = arith.constant dense<0.000000e+00> : vector<16x128xf32>
    %3 = tpu.matmul %1, %2, %cst {dimension_numbers = #tpu.dot_dimension_numbers<[1], [0], [0], [1], [0, 0, 1, 1], [], []>} : vector<16x1024xbf16>, vector<1024x128xbf16>, vector<16x128xf32> -> vector<16x128xf32>
    %c0_4 = arith.constant 0 : index
    %c0_5 = arith.constant 0 : index
    %4 = vector.load %arg4[%c0_4, %c0_5] : memref<1x128xf32, #tpu.memory_space<vmem>>, vector<1x128xf32>
    %5 = vector.broadcast %4 : vector<1x128xf32> to vector<16x128xf32>
    %6 = arith.addf %3, %5 : vector<16x128xf32>
    %cst_6 = arith.constant dense<0.000000e+00> : vector<128xf32>
    %7 = vector.multi_reduction <add>, %6, %cst_6 [0] : vector<16x128xf32> to vector<128xf32>
    %8 = vector.shape_cast %7 : vector<128xf32> to vector<1x128xf32>
    %9 = arith.mulf %6, %6 : vector<16x128xf32>
    %cst_7 = arith.constant dense<0.000000e+00> : vector<128xf32>
    %10 = vector.multi_reduction <add>, %9, %cst_7 [0] : vector<16x128xf32> to vector<128xf32>
    %11 = vector.shape_cast %10 : vector<128xf32> to vector<1x128xf32>
    %cst_8 = arith.constant 0.111111112 : f32
    %12 = vector.broadcast %cst_8 : f32 to vector<1x128xf32>
    %13 = arith.mulf %8, %12 : vector<1x128xf32>
    %cst_9 = arith.constant 0.111111112 : f32
    %14 = vector.broadcast %cst_9 : f32 to vector<1x128xf32>
    %15 = arith.mulf %11, %14 : vector<1x128xf32>
    %16 = arith.mulf %13, %13 : vector<1x128xf32>
    %17 = arith.subf %15, %16 : vector<1x128xf32>
    %cst_10 = arith.constant 0.000000e+00 : f32
    %18 = vector.broadcast %cst_10 : f32 to vector<1x128xf32>
    %19 = arith.maximumf %17, %18 : vector<1x128xf32>
    %cst_11 = arith.constant 9.99999974E-6 : f32
    %20 = vector.broadcast %cst_11 : f32 to vector<1x128xf32>
    %21 = arith.addf %19, %20 : vector<1x128xf32>
    %22 = math.rsqrt %21 : vector<1x128xf32>
    %23 = vector.broadcast %13 : vector<1x128xf32> to vector<16x128xf32>
    %24 = arith.subf %6, %23 : vector<16x128xf32>
    %25 = vector.broadcast %22 : vector<1x128xf32> to vector<16x128xf32>
    %26 = arith.mulf %24, %25 : vector<16x128xf32>
    %c0_12 = arith.constant 0 : index
    %c0_13 = arith.constant 0 : index
    %27 = vector.load %arg5[%c0_12, %c0_13] : memref<1x128xf32, #tpu.memory_space<vmem>>, vector<1x128xf32>
    %28 = vector.broadcast %27 : vector<1x128xf32> to vector<16x128xf32>
    %29 = arith.mulf %26, %28 : vector<16x128xf32>
    %c0_14 = arith.constant 0 : index
    %c0_15 = arith.constant 0 : index
    %30 = vector.load %arg6[%c0_14, %c0_15] : memref<1x128xf32, #tpu.memory_space<vmem>>, vector<1x128xf32>
    %31 = vector.broadcast %30 : vector<1x128xf32> to vector<16x128xf32>
    %32 = arith.addf %29, %31 : vector<16x128xf32>
    %cst_16 = arith.constant 2.000000e-01 : f32
    %33 = vector.broadcast %cst_16 : f32 to vector<16x128xf32>
    %34 = arith.mulf %33, %32 : vector<16x128xf32>
    %35 = arith.maximumf %32, %34 : vector<16x128xf32>
    %36 = arith.truncf %35 : vector<16x128xf32> to vector<16x128xbf16>
    %c0_17 = arith.constant 0 : index
    %c0_18 = arith.constant 0 : index
    %c0_19 = arith.constant 0 : index
    %37 = vector.load %arg7[%c0_17, %c0_18, %c0_19] : memref<1x16x128xbf16, #tpu.memory_space<vmem>>, vector<1x16x128xbf16>
    %38 = vector.shape_cast %37 : vector<1x16x128xbf16> to vector<16x128xbf16>
    %39 = vector.shape_cast %36 : vector<16x128xbf16> to vector<1x16x128xbf16>
    tpu.vector_store %arg7[%c0_17, %c0_18, %c0_19], %39 {strides = array<i32>} : memref<1x16x128xbf16, #tpu.memory_space<vmem>>, vector<1x16x128xbf16>,
    return
  }
  func.func @transform_0(%arg0: i32, %arg1: i32) -> (i32, i32, i32) {
    %c0_i32 = arith.constant 0 : i32
    %c0_i32_0 = arith.constant 0 : i32
    %c0_i32_1 = arith.constant 0 : i32
    return %arg0, %c0_i32, %c0_i32_0 : i32, i32, i32
  }
  func.func @transform_1(%arg0: i32, %arg1: i32) -> (i32, i32) {
    %c0_i32 = arith.constant 0 : i32
    %c0_i32_0 = arith.constant 0 : i32
    return %c0_i32, %arg1 : i32, i32
  }
  func.func @transform_2(%arg0: i32, %arg1: i32) -> (i32, i32) {
    %c0_i32 = arith.constant 0 : i32
    %c0_i32_0 = arith.constant 0 : i32
    return %c0_i32, %arg1 : i32, i32
  }
  func.func @transform_3(%arg0: i32, %arg1: i32) -> (i32, i32) {
    %c0_i32 = arith.constant 0 : i32
    %c0_i32_0 = arith.constant 0 : i32
    return %c0_i32, %arg1 : i32, i32
  }
  func.func @transform_4(%arg0: i32, %arg1: i32) -> (i32, i32) {
    %c0_i32 = arith.constant 0 : i32
    %c0_i32_0 = arith.constant 0 : i32
    return %c0_i32, %arg1 : i32, i32
  }
  func.func @transform_5(%arg0: i32, %arg1: i32) -> (i32, i32, i32) {
    %c0_i32 = arith.constant 0 : i32
    %c0_i32_0 = arith.constant 0 : i32
    return %arg0, %c0_i32, %arg1 : i32, i32, i32
  }
}

module attributes {stable_mosaic.version = 11 : i64} {
  func.func @_conv_fused_kernel(%arg0: i32, %arg1: i32, %arg2: memref<1x8x2048xbf16, #tpu.memory_space<vmem>>, %arg3: memref<2048x128xbf16, #tpu.memory_space<vmem>>, %arg4: memref<1x128xf32, #tpu.memory_space<vmem>>, %arg5: memref<1x128xf32, #tpu.memory_space<vmem>>, %arg6: memref<1x128xf32, #tpu.memory_space<vmem>>, %arg7: memref<1x8x128xf32, #tpu.memory_space<vmem>>) attributes {dimension_semantics = [#tpu.dimension_semantics<parallel>, #tpu.dimension_semantics<parallel>], iteration_bounds = array<i64: 2, 1>, scalar_prefetch = 0 : i64, scratch_operands = 0 : i64, tpu.core_type = #tpu.core_type<tc>, window_params = [{transform_indices = @transform_0, window_bounds = array<i64: 1, 8, 2048>}, {transform_indices = @transform_1, window_bounds = array<i64: 2048, 128>}, {transform_indices = @transform_2, window_bounds = array<i64: 1, 128>}, {transform_indices = @transform_3, window_bounds = array<i64: 1, 128>}, {transform_indices = @transform_4, window_bounds = array<i64: 1, 128>}, {transform_indices = @transform_5, window_bounds = array<i64: 1, 8, 128>}]} {
    %c0 = arith.constant 0 : index
    %c0_0 = arith.constant 0 : index
    %c0_1 = arith.constant 0 : index
    %0 = vector.load %arg2[%c0, %c0_0, %c0_1] : memref<1x8x2048xbf16, #tpu.memory_space<vmem>>, vector<1x8x2048xbf16>
    %1 = vector.shape_cast %0 : vector<1x8x2048xbf16> to vector<8x2048xbf16>
    %c0_2 = arith.constant 0 : index
    %c0_3 = arith.constant 0 : index
    %2 = vector.load %arg3[%c0_2, %c0_3] : memref<2048x128xbf16, #tpu.memory_space<vmem>>, vector<2048x128xbf16>
    %cst = arith.constant dense<0.000000e+00> : vector<8x128xf32>
    %3 = tpu.matmul %1, %2, %cst {dimension_numbers = #tpu.dot_dimension_numbers<[1], [0], [0], [1], [0, 0, 1, 1], [], []>} : vector<8x2048xbf16>, vector<2048x128xbf16>, vector<8x128xf32> -> vector<8x128xf32>
    %c0_4 = arith.constant 0 : index
    %c0_5 = arith.constant 0 : index
    %4 = vector.load %arg4[%c0_4, %c0_5] : memref<1x128xf32, #tpu.memory_space<vmem>>, vector<1x128xf32>
    %5 = vector.broadcast %4 : vector<1x128xf32> to vector<8x128xf32>
    %6 = arith.addf %3, %5 : vector<8x128xf32>
    %c0_6 = arith.constant 0 : index
    %c0_7 = arith.constant 0 : index
    %c0_8 = arith.constant 0 : index
    %7 = vector.load %arg7[%c0_6, %c0_7, %c0_8] : memref<1x8x128xf32, #tpu.memory_space<vmem>>, vector<1x8x128xf32>
    %8 = vector.shape_cast %7 : vector<1x8x128xf32> to vector<8x128xf32>
    %9 = vector.shape_cast %6 : vector<8x128xf32> to vector<1x8x128xf32>
    tpu.vector_store %arg7[%c0_6, %c0_7, %c0_8], %9 {strides = array<i32>} : memref<1x8x128xf32, #tpu.memory_space<vmem>>, vector<1x8x128xf32>,
    return
  }
  func.func @transform_0(%arg0: i32, %arg1: i32) -> (i32, i32, i32) {
    %c0_i32 = arith.constant 0 : i32
    %c0_i32_0 = arith.constant 0 : i32
    %c0_i32_1 = arith.constant 0 : i32
    return %arg0, %c0_i32, %c0_i32_0 : i32, i32, i32
  }
  func.func @transform_1(%arg0: i32, %arg1: i32) -> (i32, i32) {
    %c0_i32 = arith.constant 0 : i32
    %c0_i32_0 = arith.constant 0 : i32
    return %c0_i32, %arg1 : i32, i32
  }
  func.func @transform_2(%arg0: i32, %arg1: i32) -> (i32, i32) {
    %c0_i32 = arith.constant 0 : i32
    %c0_i32_0 = arith.constant 0 : i32
    return %c0_i32, %arg1 : i32, i32
  }
  func.func @transform_3(%arg0: i32, %arg1: i32) -> (i32, i32) {
    %c0_i32 = arith.constant 0 : i32
    %c0_i32_0 = arith.constant 0 : i32
    return %c0_i32, %arg1 : i32, i32
  }
  func.func @transform_4(%arg0: i32, %arg1: i32) -> (i32, i32) {
    %c0_i32 = arith.constant 0 : i32
    %c0_i32_0 = arith.constant 0 : i32
    return %c0_i32, %arg1 : i32, i32
  }
  func.func @transform_5(%arg0: i32, %arg1: i32) -> (i32, i32, i32) {
    %c0_i32 = arith.constant 0 : i32
    %c0_i32_0 = arith.constant 0 : i32
    return %arg0, %c0_i32, %arg1 : i32, i32, i32
  }
}

</mosaic_0001>

<bundles_post_ra>
// kernel: discriminator_forward.5
= control target key start
LH: loop header
LB: loop body
LE: loop exit
PB: predicated region body
PF: predicated region fallthrough
CT: control target
= control target key end

     0   :  { %s1181_s18 = smov 0   ;;  %s1183_s19 = smov 0   ;;  %s1322_s0 = inlined_call_operand.vmem [shape: bf16[2,256,128], index: 0, kind: input, shape index: {}]   ;;  %s1323_s1 = inlined_call_operand.vmem [shape: bf16[128,128], index: 1, kind: input, shape index: {}]   ;;  %s1324_s2 = inlined_call_operand.vmem [shape: f32[1,128], index: 2, kind: input, shape index: {}]   ;;  %s1325_s3 = inlined_call_operand.vmem [shape: f32[1,128], index: 3, kind: input, shape index: {}]   ;;  %s1326_s4 = inlined_call_operand.vmem [shape: f32[1,128], index: 4, kind: input, shape index: {}]   ;;  %s1327_s5 = inlined_call_operand.vmem [shape: bf16[2,256,128], index: 5, kind: output, shape index: {}]  }
   0x1   :  { %s1185_s20 = smov 0  }
   0x2 LB: > { %s27_s3 = sadd.s32 1, %s1145_s19  ;;  %p854_p0 = scmp.ge.s32.totalorder %s1149_s20, 1  ;;  %s1149_s20 = sphi %s1185_s20, %s15_s20   ;;  %s1145_s19 = sphi %s1183_s19, %s1329_s19   ;;  %s1141_s18 = sphi %s1181_s18, %s1328_s18  }
   0x3   : > { %p29_p1 = scmp.ge.s32.totalorder %s27_s3, 2  ;;  %p234_p2 = scmp.lt.s32.totalorder %s1149_s20, 3 }
   0x5   : > { %s1331_s3 = smov (%p29_p1, %s27_s3), 0  ;;  %p235_p3 = pnand %p854_p0, %p234_p2 }
   0x6   : > { %p278_p4 = scmp.lt.s32.totalorder (!%p235_p3), %s1141_s18, 1 }
   0x7   : > { %238 = sbr.rel (%p235_p3) target bundleno = 243 (0xf3), region = 40 }
   0xc   : > { %v982_v0 = vld [vmem:[%s1323_s1 + $0x38] sm:$0xff]  ;;  %v981_v1 = vld [vmem:[%s1323_s1 + $0x30] sm:$0xff]  ;;  %v980_v2 = vld [vmem:[%s1323_s1 + $0x28] sm:$0xff]  ;;  %s1333_s18 = smov (!%p278_p4, %s1141_s18), 1 }
   0xd   : > { %500 = vmatpush.bf16.msra.mxu0 %v982_v0  ;;  %1078 = vmatpush.bf16.msra.mxu1 %v982_v0  ;;  %v979_v3 = vld [vmem:[%s1323_s1 + $0x20] sm:$0xff]  ;;  %v978_v4 = vld [vmem:[%s1323_s1 + $0x18] sm:$0xff]  ;;  %v977_v5 = vld [vmem:[%s1323_s1 + $0x10] sm:$0xff]  ;;  %s957_s9 = sshll.u32 %s1333_s18, 7 }
   0xe   : > { %1079 = vmatpush.bf16.msra.mxu2 %v982_v0  ;;  %1080 = vmatpush.bf16.msra.mxu3 %v982_v0  ;;  %v976_v6 = vld [vmem:[%s1323_s1 + $0x8] sm:$0xff]  ;;  %v975_v7 = vld [vmem:[%s1323_s1] sm:$0xff]  ;;  %s1235_s14 = scalar_lea.vmem %s1322_s0, %s957_s9  ;;  %s1269_s21 = scalar_lea.vmem %s1327_s5, %s957_s9 }
   0xf   : > { %v959_v8 = vld [vmem:[%s1235_s14] sm:$0xff]  ;;  %v960_v12 = vld [vmem:[%s1235_s14 + $0x8] sm:$0xff]  ;;  %v961_v16 = vld [vmem:[%s1235_s14 + $0x10] sm:$0xff] }
  0x10   : > { %v963_v9 = vld [vmem:[%s1235_s14 + $0x20] sm:$0xff]  ;;  %v964_v13 = vld [vmem:[%s1235_s14 + $0x28] sm:$0xff]  ;;  %v965_v17 = vld [vmem:[%s1235_s14 + $0x30] sm:$0xff] }
  0x11   : > { %501 = vmatpush.bf16.msra.mxu0 %v981_v1  ;;  %1081 = vmatpush.bf16.msra.mxu1 %v981_v1  ;;  %v967_v10 = vld [vmem:[%s1235_s14 + $0x40] sm:$0xff]  ;;  %v968_v14 = vld [vmem:[%s1235_s14 + $0x48] sm:$0xff]  ;;  %v969_v18 = vld [vmem:[%s1235_s14 + $0x50] sm:$0xff] }
  0x12   : > { %1082 = vmatpush.bf16.msra.mxu2 %v981_v1  ;;  %1083 = vmatpush.bf16.msra.mxu3 %v981_v1  ;;  %v971_v11 = vld [vmem:[%s1235_s14 + $0x60] sm:$0xff]  ;;  %v972_v15 = vld [vmem:[%s1235_s14 + $0x68] sm:$0xff]  ;;  %v973_v19 = vld [vmem:[%s1235_s14 + $0x70] sm:$0xff] }
  0x13   : > { %v962_v20 = vld [vmem:[%s1235_s14 + $0x18] sm:$0xff]  ;;  %v1256_v26 = vld [vmem:[%s1324_s2] ss:$0 sm:$0xff] }
  0x14   : > { %v966_v21 = vld [vmem:[%s1235_s14 + $0x38] sm:$0xff] }
  0x15   : > { %502 = vmatpush.bf16.msra.mxu0 %v980_v2  ;;  %1084 = vmatpush.bf16.msra.mxu1 %v980_v2  ;;  %v970_v22 = vld [vmem:[%s1235_s14 + $0x58] sm:$0xff] }
  0x16   : > { %1085 = vmatpush.bf16.msra.mxu2 %v980_v2  ;;  %1086 = vmatpush.bf16.msra.mxu3 %v980_v2  ;;  %v974_v23 = vld [vmem:[%s1235_s14 + $0x78] sm:$0xff] }
  0x19   : > { %503 = vmatpush.bf16.msra.mxu0 %v979_v3  ;;  %1087 = vmatpush.bf16.msra.mxu1 %v979_v3 }
  0x1a   : > { %1088 = vmatpush.bf16.msra.mxu2 %v979_v3  ;;  %1089 = vmatpush.bf16.msra.mxu3 %v979_v3 }
  0x1d   : > { %504 = vmatpush.bf16.msra.mxu0 %v978_v4  ;;  %1090 = vmatpush.bf16.msra.mxu1 %v978_v4 }
  0x1e   : > { %1091 = vmatpush.bf16.msra.mxu2 %v978_v4  ;;  %1092 = vmatpush.bf16.msra.mxu3 %v978_v4 }
  0x21   : > { %505 = vmatpush.bf16.msra.mxu0 %v977_v5  ;;  %1093 = vmatpush.bf16.msra.mxu1 %v977_v5 }
  0x22   : > { %1094 = vmatpush.bf16.msra.mxu2 %v977_v5  ;;  %1095 = vmatpush.bf16.msra.mxu3 %v977_v5 }
  0x25   : > { %506 = vmatpush.bf16.msra.mxu0 %v976_v6  ;;  %1096 = vmatpush.bf16.msra.mxu1 %v976_v6 }
  0x26   : > { %1097 = vmatpush.bf16.msra.mxu2 %v976_v6  ;;  %1098 = vmatpush.bf16.msra.mxu3 %v976_v6 }
  0x29   : > { %507 = vmatpush.bf16.msra.mxu0 %v975_v7  ;;  %1099 = vmatpush.bf16.msra.mxu1 %v975_v7 }
  0x2a   : > { %1100 = vmatpush.bf16.msra.mxu2 %v975_v7  ;;  %1101 = vmatpush.bf16.msra.mxu3 %v975_v7 }
  0x2c   : > { %508 = vmatmul.bf16.vlgmr.msra.gmra.mxu0 %v959_v8  ;;  %528 = vmatmul.bf16.vlgmr.msra.gmra.mxu1 %v963_v9 }
  0x2d   : > { %548 = vmatmul.bf16.vlgmr.msra.gmra.mxu2 %v967_v10  ;;  %568 = vmatmul.bf16.vlgmr.msra.gmra.mxu3 %v971_v11 }
  0x3c   : > { %513 = vmatmul.bf16.gmra.mxu0 %v960_v12  ;;  %533 = vmatmul.bf16.gmra.mxu1 %v964_v13 }
  0x3d   : > { %553 = vmatmul.bf16.gmra.mxu2 %v968_v14  ;;  %573 = vmatmul.bf16.gmra.mxu3 %v972_v15 }
  0x4c   : > { %518 = vmatmul.bf16.gmra.mxu0 %v961_v16  ;;  %538 = vmatmul.bf16.gmra.mxu1 %v965_v17 }
  0x4d   : > { %558 = vmatmul.bf16.gmra.mxu2 %v969_v18  ;;  %578 = vmatmul.bf16.gmra.mxu3 %v973_v19 }
  0x5c   : > { %523 = vmatmul.bf16.gmra.mxu0 %v962_v20  ;;  %543 = vmatmul.bf16.gmra.mxu1 %v966_v21 }
  0x5d   : > { %563 = vmatmul.bf16.gmra.mxu2 %v970_v22  ;;  %583 = vmatmul.bf16.gmra.mxu3 %v974_v23 }
  0xa9   : > { %v509_v24 = vpop.f32.mrf.mxu0  ;;  %v529_v25 = vpop.f32.mrf.mxu1 }
  0xaa   : > { %v510_v27 = vadd.f32 %v1256_v26, %v509_v24  ;;  %v530_v28 = vadd.f32 %v1256_v26, %v529_v25 }
  0xac   : > { %v589_v33 = vmul.f32 0.2, %v510_v27  ;;  %v597_v34 = vmul.f32 0.2, %v530_v28 }
  0xae   : > { %v621_v41 = vmax.f32 %v510_v27, %v589_v33  ;;  %v629_v42 = vmax.f32 %v530_v28, %v597_v34 }
  0xb0   : > { %v549_v29 = vpop.f32.mrf.mxu2  ;;  %v569_v30 = vpop.f32.mrf.mxu3 }
  0xb1   : > { %v511_v31 = vpop.f32.mrf.mxu0  ;;  %v531_v32 = vpop.f32.mrf.mxu1  ;;  %v550_v39 = vadd.f32 %v1256_v26, %v549_v29  ;;  %v570_v40 = vadd.f32 %v1256_v26, %v569_v30 }
  0xb2   : > { %v512_v35 = vadd.f32 %v1256_v26, %v511_v31  ;;  %v532_v36 = vadd.f32 %v1256_v26, %v531_v32 }
  0xb3   : > { %v605_v49 = vmul.f32 0.2, %v550_v39  ;;  %v613_v50 = vmul.f32 0.2, %v570_v40 }
  0xb4   : > { %v590_v37 = vmul.f32 0.2, %v512_v35  ;;  %v598_v38 = vmul.f32 0.2, %v532_v36 }
  0xb5   : > { %v637_v57 = vmax.f32 %v550_v39, %v605_v49  ;;  %v645_v58 = vmax.f32 %v570_v40, %v613_v50 }
  0xb6   : > { %v622_v43 = vmax.f32 %v512_v35, %v590_v37  ;;  %v630_v44 = vmax.f32 %v532_v36, %v598_v38 }
  0xb8   : > { %v986_v45 = vpack.c.bf16 %v622_v43, %v621_v41  ;;  %v1006_v46 = vpack.c.bf16 %v630_v44, %v629_v42  ;;  %v551_v47 = vpop.f32.mrf.mxu2  ;;  %v571_v48 = vpop.f32.mrf.mxu3 }
  0xb9   : > { %v552_v51 = vadd.f32 %v1256_v26, %v551_v47  ;;  %v572_v52 = vadd.f32 %v1256_v26, %v571_v48  ;;  %v514_v53 = vpop.f32.mrf.mxu0  ;;  %v534_v54 = vpop.f32.mrf.mxu1 }
  0xba   : > { %987 = vst [vmem:[%s1269_s21] sm:$0xff] %v986_v45   ;;  %v515_v61 = vadd.f32 %v1256_v26, %v514_v53  ;;  %v535_v62 = vadd.f32 %v1256_v26, %v534_v54 }
  0xbb   : > { %1066 = vst [vmem:[%s1269_s21 + $0x20] sm:$0xff] %v1006_v46   ;;  %v606_v55 = vmul.f32 0.2, %v552_v51  ;;  %v614_v56 = vmul.f32 0.2, %v572_v52 }
  0xbc   : > { %v591_v5 = vmul.f32 0.2, %v515_v61  ;;  %v599_v6 = vmul.f32 0.2, %v535_v62 }
  0xbd   : > { %v638_v59 = vmax.f32 %v552_v51, %v606_v55  ;;  %v646_v60 = vmax.f32 %v572_v52, %v614_v56 }
  0xbe   : > { %v623_v13 = vmax.f32 %v515_v61, %v591_v5  ;;  %v631_v14 = vmax.f32 %v535_v62, %v599_v6 }
  0xbf   : > { %v1026_v63 = vpack.c.bf16 %v638_v59, %v637_v57  ;;  %v1046_v0 = vpack.c.bf16 %v646_v60, %v645_v58 }
  0xc0   : > { %v554_v1 = vpop.f32.mrf.mxu2  ;;  %v574_v2 = vpop.f32.mrf.mxu3 }
  0xc1   : > { %1070 = vst [vmem:[%s1269_s21 + $0x40] sm:$0xff] %v1026_v63   ;;  %v516_v3 = vpop.f32.mrf.mxu0  ;;  %v536_v4 = vpop.f32.mrf.mxu1  ;;  %v555_v11 = vadd.f32 %v1256_v26, %v554_v1  ;;  %v575_v12 = vadd.f32 %v1256_v26, %v574_v2 }
  0xc2   : > { %1074 = vst [vmem:[%s1269_s21 + $0x60] sm:$0xff] %v1046_v0   ;;  %v517_v7 = vadd.f32 %v1256_v26, %v516_v3  ;;  %v537_v8 = vadd.f32 %v1256_v26, %v536_v4 }
  0xc3   : > { %v607_v21 = vmul.f32 0.2, %v555_v11  ;;  %v615_v22 = vmul.f32 0.2, %v575_v12 }
  0xc4   : > { %v592_v9 = vmul.f32 0.2, %v517_v7  ;;  %v600_v10 = vmul.f32 0.2, %v537_v8 }
  0xc5   : > { %v639_v30 = vmax.f32 %v555_v11, %v607_v21  ;;  %v647_v31 = vmax.f32 %v575_v12, %v615_v22 }
  0xc6   : > { %v624_v15 = vmax.f32 %v517_v7, %v592_v9  ;;  %v632_v16 = vmax.f32 %v537_v8, %v600_v10 }
  0xc8   : > { %v991_v17 = vpack.c.bf16 %v624_v15, %v623_v13  ;;  %v1011_v18 = vpack.c.bf16 %v632_v16, %v631_v14  ;;  %v556_v19 = vpop.f32.mrf.mxu2  ;;  %v576_v20 = vpop.f32.mrf.mxu3 }
  0xc9   : > { %v557_v23 = vadd.f32 %v1256_v26, %v556_v19  ;;  %v577_v24 = vadd.f32 %v1256_v26, %v576_v20  ;;  %v519_v25 = vpop.f32.mrf.mxu0  ;;  %v539_v27 = vpop.f32.mrf.mxu1 }
  0xca   : > { %1063 = vst [vmem:[%s1269_s21 + $0x8] sm:$0xff] %v991_v17   ;;  %v520_v34 = vadd.f32 %v1256_v26, %v519_v25  ;;  %v540_v35 = vadd.f32 %v1256_v26, %v539_v27 }
  0xcb   : > { %1067 = vst [vmem:[%s1269_s21 + $0x28] sm:$0xff] %v1011_v18   ;;  %v608_v28 = vmul.f32 0.2, %v557_v23  ;;  %v616_v29 = vmul.f32 0.2, %v577_v24 }
  0xcc   : > { %v593_v42 = vmul.f32 0.2, %v520_v34  ;;  %v601_v43 = vmul.f32 0.2, %v540_v35 }
  0xcd   : > { %v640_v32 = vmax.f32 %v557_v23, %v608_v28  ;;  %v648_v33 = vmax.f32 %v577_v24, %v616_v29 }
  0xce   : > { %v625_v50 = vmax.f32 %v520_v34, %v593_v42  ;;  %v633_v51 = vmax.f32 %v540_v35, %v601_v43 }
  0xcf   : > { %v1031_v36 = vpack.c.bf16 %v640_v32, %v639_v30  ;;  %v1051_v37 = vpack.c.bf16 %v648_v33, %v647_v31 }
  0xd0   : > { %v559_v38 = vpop.f32.mrf.mxu2  ;;  %v579_v39 = vpop.f32.mrf.mxu3 }
  0xd1   : > { %1071 = vst [vmem:[%s1269_s21 + $0x48] sm:$0xff] %v1031_v36   ;;  %v521_v40 = vpop.f32.mrf.mxu0  ;;  %v541_v41 = vpop.f32.mrf.mxu1  ;;  %v560_v48 = vadd.f32 %v1256_v26, %v559_v38  ;;  %v580_v49 = vadd.f32 %v1256_v26, %v579_v39 }
  0xd2   : > { %1075 = vst [vmem:[%s1269_s21 + $0x68] sm:$0xff] %v1051_v37   ;;  %v522_v44 = vadd.f32 %v1256_v26, %v521_v40  ;;  %v542_v45 = vadd.f32 %v1256_v26, %v541_v41 }
  0xd3   : > { %v609_v58 = vmul.f32 0.2, %v560_v48  ;;  %v617_v59 = vmul.f32 0.2, %v580_v49 }
  0xd4   : > { %v594_v46 = vmul.f32 0.2, %v522_v44  ;;  %v602_v47 = vmul.f32 0.2, %v542_v45 }
  0xd5   : > { %v641_v2 = vmax.f32 %v560_v48, %v609_v58  ;;  %v649_v3 = vmax.f32 %v580_v49, %v617_v59 }
  0xd6   : > { %v626_v52 = vmax.f32 %v522_v44, %v594_v46  ;;  %v634_v53 = vmax.f32 %v542_v45, %v602_v47 }
  0xd8   : > { %v996_v54 = vpack.c.bf16 %v626_v52, %v625_v50  ;;  %v1016_v55 = vpack.c.bf16 %v634_v53, %v633_v51  ;;  %v561_v56 = vpop.f32.mrf.mxu2  ;;  %v581_v57 = vpop.f32.mrf.mxu3 }
  0xd9   : > { %v562_v60 = vadd.f32 %v1256_v26, %v561_v56  ;;  %v582_v61 = vadd.f32 %v1256_v26, %v581_v57  ;;  %v524_v62 = vpop.f32.mrf.mxu0  ;;  %v544_v63 = vpop.f32.mrf.mxu1 }
  0xda   : > { %1064 = vst [vmem:[%s1269_s21 + $0x10] sm:$0xff] %v996_v54   ;;  %v525_v6 = vadd.f32 %v1256_v26, %v524_v62  ;;  %v545_v7 = vadd.f32 %v1256_v26, %v544_v63 }
  0xdb   : > { %1068 = vst [vmem:[%s1269_s21 + $0x30] sm:$0xff] %v1016_v55   ;;  %v610_v0 = vmul.f32 0.2, %v562_v60  ;;  %v618_v1 = vmul.f32 0.2, %v582_v61 }
  0xdc   : > { %v595_v14 = vmul.f32 0.2, %v525_v6  ;;  %v603_v15 = vmul.f32 0.2, %v545_v7 }
  0xdd   : > { %v642_v4 = vmax.f32 %v562_v60, %v610_v0  ;;  %v650_v5 = vmax.f32 %v582_v61, %v618_v1 }
  0xde   : > { %v627_v22 = vmax.f32 %v525_v6, %v595_v14  ;;  %v635_v23 = vmax.f32 %v545_v7, %v603_v15 }
  0xdf   : > { %v1036_v8 = vpack.c.bf16 %v642_v4, %v641_v2  ;;  %v1056_v9 = vpack.c.bf16 %v650_v5, %v649_v3 }
  0xe0   : > { %v564_v10 = vpop.f32.mrf.mxu2  ;;  %v584_v11 = vpop.f32.mrf.mxu3 }
  0xe1   : > { %1072 = vst [vmem:[%s1269_s21 + $0x50] sm:$0xff] %v1036_v8   ;;  %v526_v12 = vpop.f32.mrf.mxu0  ;;  %v546_v13 = vpop.f32.mrf.mxu1  ;;  %v565_v20 = vadd.f32 %v1256_v26, %v564_v10  ;;  %v585_v21 = vadd.f32 %v1256_v26, %v584_v11 }
  0xe2   : > { %1076 = vst [vmem:[%s1269_s21 + $0x70] sm:$0xff] %v1056_v9   ;;  %v527_v16 = vadd.f32 %v1256_v26, %v526_v12  ;;  %v547_v17 = vadd.f32 %v1256_v26, %v546_v13 }
  0xe3   : > { %v611_v31 = vmul.f32 0.2, %v565_v20  ;;  %v619_v32 = vmul.f32 0.2, %v585_v21 }
  0xe4   : > { %v596_v18 = vmul.f32 0.2, %v527_v16  ;;  %v604_v19 = vmul.f32 0.2, %v547_v17 }
  0xe5   : > { %v643_v37 = vmax.f32 %v565_v20, %v611_v31  ;;  %v651_v38 = vmax.f32 %v585_v21, %v619_v32 }
  0xe6   : > { %v628_v24 = vmax.f32 %v527_v16, %v596_v18  ;;  %v636_v25 = vmax.f32 %v547_v17, %v604_v19 }
  0xe8   : > { %v1001_v27 = vpack.c.bf16 %v628_v24, %v627_v22  ;;  %v1021_v28 = vpack.c.bf16 %v636_v25, %v635_v23  ;;  %v566_v29 = vpop.f32.mrf.mxu2  ;;  %v586_v30 = vpop.f32.mrf.mxu3 }
  0xe9   : > { %v567_v33 = vadd.f32 %v1256_v26, %v566_v29  ;;  %v587_v34 = vadd.f32 %v1256_v26, %v586_v30 }
  0xea   : > { %1065 = vst [vmem:[%s1269_s21 + $0x18] sm:$0xff] %v1001_v27  }
  0xeb   : > { %1069 = vst [vmem:[%s1269_s21 + $0x38] sm:$0xff] %v1021_v28   ;;  %v612_v35 = vmul.f32 0.2, %v567_v33  ;;  %v620_v36 = vmul.f32 0.2, %v587_v34 }
  0xed   : > { %v644_v39 = vmax.f32 %v567_v33, %v612_v35  ;;  %v652_v40 = vmax.f32 %v587_v34, %v620_v36 }
  0xef   : > { %v1041_v41 = vpack.c.bf16 %v644_v39, %v643_v37  ;;  %v1061_v42 = vpack.c.bf16 %v652_v40, %v651_v38 }
  0xf1   : > { %1073 = vst [vmem:[%s1269_s21 + $0x58] sm:$0xff] %v1041_v41  }
  0xf2   : > { %1077 = vst [vmem:[%s1269_s21 + $0x78] sm:$0xff] %v1061_v42  }
  0xf3 PF: > { %s15_s20 = sadd.s32 1, %s1149_s20   ;;  %s1328_s18 = smov %s1145_s19 }
  0xf4   : > { %p12_p5 = scmp.ge.s32.totalorder %s15_s20, 4   ;;  %s1329_s19 = smov %s1331_s3 }
  0xf6   :  { %14 = sbr.rel (!%p12_p5) target bundleno = 2 (0x2), region = 82 }

// kernel: discriminator_forward.6
= control target key start
LH: loop header
LB: loop body
LE: loop exit
PB: predicated region body
PF: predicated region fallthrough
CT: control target
= control target key end

     0   :  { %s1052_s18 = smov 0   ;;  %s1054_s19 = smov 0   ;;  %s1204_s0 = inlined_call_operand.vmem [shape: bf16[2,64,256], index: 0, kind: input, shape index: {}]   ;;  %s1205_s1 = inlined_call_operand.vmem [shape: bf16[256,128], index: 1, kind: input, shape index: {}]   ;;  %s1206_s2 = inlined_call_operand.vmem [shape: f32[1,128], index: 2, kind: input, shape index: {}]   ;;  %s1207_s3 = inlined_call_operand.vmem [shape: f32[1,128], index: 3, kind: input, shape index: {}]   ;;  %s1208_s4 = inlined_call_operand.vmem [shape: f32[1,128], index: 4, kind: input, shape index: {}]   ;;  %s1209_s5 = inlined_call_operand.vmem [shape: bf16[2,64,128], index: 5, kind: output, shape index: {}]  }
   0x1   :  { %s1056_s20 = smov 0  }
   0x2 LB: > { %s27_s21 = sadd.s32 1, %s1016_s19  ;;  %p801_p0 = scmp.ge.s32.totalorder %s1020_s20, 1  ;;  %s1020_s20 = sphi %s1056_s20, %s15_s20   ;;  %s1016_s19 = sphi %s1054_s19, %s1211_s19   ;;  %s1012_s18 = sphi %s1052_s18, %s1210_s18  }
   0x3   : > { %p29_p1 = scmp.ge.s32.totalorder %s27_s21, 2  ;;  %p234_p2 = scmp.lt.s32.totalorder %s1020_s20, 3 }
   0x5   : > { %s1213_s21 = smov (%p29_p1, %s27_s21), 0  ;;  %p235_p3 = pnand %p801_p0, %p234_p2 }
   0x6   : > { %p278_p4 = scmp.lt.s32.totalorder (!%p235_p3), %s1012_s18, 1 }
   0x7   : > { %238 = sbr.rel (%p235_p3) target bundleno = 264 (0x108), region = 40 }
   0xc   : > { %v921_v0 = vld [vmem:[%s1205_s1 + $0x38] sm:$0xff]  ;;  %v920_v2 = vld [vmem:[%s1205_s1 + $0x30] sm:$0xff]  ;;  %v919_v4 = vld [vmem:[%s1205_s1 + $0x28] sm:$0xff]  ;;  %s1215_s18 = smov (!%p278_p4, %s1012_s18), 1 }
   0xd   : > { %v929_v1 = vld [vmem:[%s1205_s1 + $0x78] sm:$0xff]  ;;  %484 = vmatpush.bf16.msra.mxu0 %v921_v0  ;;  %953 = vmatpush.bf16.msra.mxu2 %v921_v0  ;;  %v928_v3 = vld [vmem:[%s1205_s1 + $0x70] sm:$0xff]  ;;  %v927_v5 = vld [vmem:[%s1205_s1 + $0x68] sm:$0xff]  ;;  %s904_s25 = sshll.u32 %s1215_s18, 6  ;;  %s905_s22 = sshll.u32 %s1215_s18, 5 }
   0xe   : > { %513 = vmatpush.bf16.msra.mxu1 %v929_v1  ;;  %961 = vmatpush.bf16.msra.mxu3 %v929_v1  ;;  %v918_v6 = vld [vmem:[%s1205_s1 + $0x20] sm:$0xff]  ;;  %v917_v8 = vld [vmem:[%s1205_s1 + $0x18] sm:$0xff]  ;;  %v916_v10 = vld [vmem:[%s1205_s1 + $0x10] sm:$0xff]  ;;  %s1119_s30 = scalar_lea.vmem %s1204_s0, %s904_s25  ;;  %s303_s25 = scalar_lea.vmem %s1209_s5, %s905_s22 }
   0xf   : > { %v926_v7 = vld [vmem:[%s1205_s1 + $0x60] sm:$0xff]  ;;  %v925_v9 = vld [vmem:[%s1205_s1 + $0x58] sm:$0xff]  ;;  %v924_v11 = vld [vmem:[%s1205_s1 + $0x50] sm:$0xff] }
  0x10   : > { %v915_v12 = vld [vmem:[%s1205_s1 + $0x8] sm:$0xff]  ;;  %v914_v14 = vld [vmem:[%s1205_s1] sm:$0xff]  ;;  %v816_v28 = vld [vmem:[%s1119_s30 + $0x10] sm:$0xf] }
  0x11   : > { %485 = vmatpush.bf16.msra.mxu0 %v920_v2  ;;  %954 = vmatpush.bf16.msra.mxu2 %v920_v2  ;;  %v923_v13 = vld [vmem:[%s1205_s1 + $0x48] sm:$0xff]  ;;  %v922_v15 = vld [vmem:[%s1205_s1 + $0x40] sm:$0xff]  ;;  %v909_v29 = vld [vmem:[%s1119_s30 + $0x14] sm:$0xf0] }
  0x12   : > { %514 = vmatpush.bf16.msra.mxu1 %v928_v3  ;;  %962 = vmatpush.bf16.msra.mxu3 %v928_v3  ;;  %v808_v16 = vld [vmem:[%s1119_s30] sm:$0xf]  ;;  %v907_v17 = vld [vmem:[%s1119_s30 + $0x4] sm:$0xf0]  ;;  %v906_v20 = vld [vmem:[%s1119_s30 + $0x4] sm:$0xf]  ;;  %v817_v36 = vor.u32 %v909_v29, %v816_v28 }
  0x13   : > { %v824_v18 = vld [vmem:[%s1119_s30 + $0x20] sm:$0xf]  ;;  %v911_v19 = vld [vmem:[%s1119_s30 + $0x24] sm:$0xf0]  ;;  %v810_v21 = vld [vmem:[%s1119_s30 + $0x8] sm:$0xf0]  ;;  %v809_v24 = vor.u32 %v907_v17, %v808_v16 }
  0x14   : > { %v910_v22 = vld [vmem:[%s1119_s30 + $0x24] sm:$0xf]  ;;  %v826_v23 = vld [vmem:[%s1119_s30 + $0x28] sm:$0xf0]  ;;  %v825_v25 = vor.u32 %v911_v19, %v824_v18  ;;  %v813_v26 = vor.u32 %v906_v20, %v810_v21  ;;  %v832_v30 = vld [vmem:[%s1119_s30 + $0x30] sm:$0xf] }
  0x15   : > { %486 = vmatpush.bf16.msra.mxu0 %v919_v4  ;;  %955 = vmatpush.bf16.msra.mxu2 %v919_v4  ;;  %v829_v27 = vor.u32 %v910_v22, %v826_v23  ;;  %v913_v31 = vld [vmem:[%s1119_s30 + $0x34] sm:$0xf0]  ;;  %v908_v32 = vld [vmem:[%s1119_s30 + $0x14] sm:$0xf]  ;;  %v818_v33 = vld [vmem:[%s1119_s30 + $0x18] sm:$0xf0] }
  0x16   : > { %515 = vmatpush.bf16.msra.mxu1 %v927_v5  ;;  %963 = vmatpush.bf16.msra.mxu3 %v927_v5  ;;  %v912_v34 = vld [vmem:[%s1119_s30 + $0x34] sm:$0xf]  ;;  %v834_v35 = vld [vmem:[%s1119_s30 + $0x38] sm:$0xf0]  ;;  %v833_v37 = vor.u32 %v913_v31, %v832_v30  ;;  %v821_v38 = vor.u32 %v908_v32, %v818_v33  ;;  %v993_v46 = vld [vmem:[%s1206_s2] ss:$0 sm:$0xff] }
  0x17   : > { %v837_v39 = vor.u32 %v912_v34, %v834_v35 }
  0x19   : > { %487 = vmatpush.bf16.msra.mxu0 %v918_v6  ;;  %956 = vmatpush.bf16.msra.mxu2 %v918_v6 }
  0x1a   : > { %516 = vmatpush.bf16.msra.mxu1 %v926_v7  ;;  %964 = vmatpush.bf16.msra.mxu3 %v926_v7 }
  0x1d   : > { %488 = vmatpush.bf16.msra.mxu0 %v917_v8  ;;  %957 = vmatpush.bf16.msra.mxu2 %v917_v8 }
  0x1e   : > { %517 = vmatpush.bf16.msra.mxu1 %v925_v9  ;;  %965 = vmatpush.bf16.msra.mxu3 %v925_v9 }
  0x21   : > { %489 = vmatpush.bf16.msra.mxu0 %v916_v10  ;;  %958 = vmatpush.bf16.msra.mxu2 %v916_v10 }
  0x22   : > { %518 = vmatpush.bf16.msra.mxu1 %v924_v11  ;;  %966 = vmatpush.bf16.msra.mxu3 %v924_v11 }
  0x25   : > { %490 = vmatpush.bf16.msra.mxu0 %v915_v12  ;;  %959 = vmatpush.bf16.msra.mxu2 %v915_v12 }
  0x26   : > { %519 = vmatpush.bf16.msra.mxu1 %v923_v13  ;;  %967 = vmatpush.bf16.msra.mxu3 %v923_v13 }
  0x29   : > { %491 = vmatpush.bf16.msra.mxu0 %v914_v14  ;;  %960 = vmatpush.bf16.msra.mxu2 %v914_v14 }
  0x2a   : > { %520 = vmatpush.bf16.msra.mxu1 %v922_v15  ;;  %968 = vmatpush.bf16.msra.mxu3 %v922_v15 }
  0x2c   : > { %492 = vmatmul.bf16.vlgmr.msra.gmra.mxu0 %v809_v24  ;;  %502 = vmatmul.bf16.vlgmr.msra.gmra.mxu2 %v825_v25 }
  0x2d   : > { %521 = vmatmul.bf16.vlgmr.msra.gmra.mxu1 %v813_v26  ;;  %531 = vmatmul.bf16.vlgmr.msra.gmra.mxu3 %v829_v27 }
  0x3c   : > { %497 = vmatmul.bf16.gmra.mxu0 %v817_v36  ;;  %507 = vmatmul.bf16.gmra.mxu2 %v833_v37 }
  0x3d   : > { %526 = vmatmul.bf16.gmra.mxu1 %v821_v38  ;;  %536 = vmatmul.bf16.gmra.mxu3 %v837_v39 }
  0xa9   : > { %v493_v40 = vpop.f32.mrf.mxu0 }
  0xaa   : > { %v522_v41 = vpop.f32.mrf.mxu1  ;;  %v494_v50 = vadd.f32 %v993_v46, %v493_v40 }
  0xac   : > { %v1151_v55 = vadd.f32 %v522_v41, %v494_v50 }
  0xae   : > { %v555_v61 = vmul.f32 %v1151_v55, %v1151_v55 }
  0xaf   : > { %v503_v42 = vpop.f32.mrf.mxu2 }
  0xb0   : > { %v532_v43 = vpop.f32.mrf.mxu3  ;;  %v504_v57 = vadd.f32 %v993_v46, %v503_v42 }
  0xb1   : > { %v495_v44 = vpop.f32.mrf.mxu0 }
  0xb2   : > { %v524_v45 = vpop.f32.mrf.mxu1  ;;  %v496_v48 = vadd.f32 %v993_v46, %v495_v44  ;;  %v1163_v3 = vadd.f32 %v532_v43, %v504_v57 }
  0xb4   : > { %v1149_v54 = vadd.f32 %v524_v45, %v496_v48  ;;  %v559_v13 = vmul.f32 %v1163_v3, %v1163_v3 }
  0xb6   : > { %v556_v59 = vmul.f32 %v1149_v54, %v1149_v54  ;;  %v542_v63 = vadd.f32 %v1149_v54, %v1151_v55 }
  0xb7   : > { %v505_v47 = vpop.f32.mrf.mxu2 }
  0xb8   : > { %v534_v49 = vpop.f32.mrf.mxu3  ;;  %v506_v0 = vadd.f32 %v993_v46, %v505_v47  ;;  %v563_v5 = vadd.f32 %v556_v59, %v555_v61 }
  0xb9   : > { %v498_v51 = vpop.f32.mrf.mxu0 }
  0xba   : > { %v499_v52 = vadd.f32 %v993_v46, %v498_v51  ;;  %v527_v53 = vpop.f32.mrf.mxu1  ;;  %v1168_v9 = vadd.f32 %v534_v49, %v506_v0 }
  0xbc   : > { %v1153_v56 = vadd.f32 %v527_v53, %v499_v52  ;;  %v560_v20 = vmul.f32 %v1168_v9, %v1168_v9 }
  0xbe   : > { %v557_v1 = vmul.f32 %v1153_v56, %v1153_v56  ;;  %v543_v6 = vadd.f32 %v542_v63, %v1153_v56  ;;  %v994_v63 = vld [vmem:[%s1207_s3] ss:$0 sm:$0xff] }
  0xbf   : > { %v508_v58 = vpop.f32.mrf.mxu2 }
  0xc0   : > { %v537_v60 = vpop.f32.mrf.mxu3  ;;  %v509_v7 = vadd.f32 %v993_v46, %v508_v58  ;;  %v564_v10 = vadd.f32 %v563_v5, %v557_v1 }
  0xc1   : > { %v500_v62 = vpop.f32.mrf.mxu0 }
  0xc2   : > { %v501_v2 = vadd.f32 %v993_v46, %v500_v62  ;;  %v529_v4 = vpop.f32.mrf.mxu1  ;;  %v538_v15 = vadd.f32 %v537_v60, %v509_v7 }
  0xc4   : > { %v1166_v8 = vadd.f32 %v529_v4, %v501_v2  ;;  %v561_v24 = vmul.f32 %v538_v15, %v538_v15 }
  0xc6   : > { %v544_v11 = vadd.f32 %v543_v6, %v1166_v8  ;;  %v558_v12 = vmul.f32 %v1166_v8, %v1166_v8 }
  0xc7   : > { %v510_v14 = vpop.f32.mrf.mxu2 }
  0xc8   : > { %v545_v16 = vadd.f32 %v544_v11, %v1163_v3  ;;  %v565_v17 = vadd.f32 %v564_v10, %v558_v12  ;;  %v511_v18 = vadd.f32 %v993_v46, %v510_v14  ;;  %v539_v19 = vpop.f32.mrf.mxu3 }
  0xca   : > { %v566_v21 = vadd.f32 %v565_v17, %v559_v13  ;;  %v540_v22 = vadd.f32 %v539_v19, %v511_v18  ;;  %v546_v23 = vadd.f32 %v545_v16, %v1168_v9 }
  0xcc   : > { %v547_v25 = vadd.f32 %v546_v23, %v538_v15  ;;  %v567_v26 = vadd.f32 %v566_v21, %v560_v20  ;;  %v562_v28 = vmul.f32 %v540_v22, %v540_v22 }
  0xce   : > { %v548_v27 = vadd.f32 %v547_v25, %v540_v22  ;;  %v568_v29 = vadd.f32 %v567_v26, %v561_v24 }
  0xd0   : > { %v549_v30 = vrot.slane %v548_v27, 4  ;;  %v569_v31 = vadd.f32 %v568_v29, %v562_v28 }
  0xd2   : > { %v550_v32 = vadd.f32 %v549_v30, %v548_v27  ;;  %v570_v33 = vrot.slane %v569_v31, 4 }
  0xd4   : > { %v551_v34 = vrot.slane %v550_v32, 2  ;;  %v571_v35 = vadd.f32 %v570_v33, %v569_v31 }
  0xd6   : > { %v552_v36 = vadd.f32 %v551_v34, %v550_v32  ;;  %v572_v37 = vrot.slane %v571_v35, 2 }
  0xd8   : > { %v553_v38 = vrot.slane %v552_v36, 1  ;;  %v573_v39 = vadd.f32 %v572_v37, %v571_v35 }
  0xda   : > { %v554_v40 = vadd.f32 %v553_v38, %v552_v36  ;;  %v574_v41 = vrot.slane %v573_v39, 1 }
  0xdc   : > { %v575_v42 = vadd.f32 %v574_v41, %v573_v39  ;;  %v576_v43 = vmul.f32 0.015625, %v554_v40 }
  0xde   : > { %v577_v44 = vmul.f32 0.015625, %v575_v42  ;;  %v578_v45 = vmul.f32 %v576_v43, %v576_v43  ;;  %v592_v58 = vsub.f32 %v1151_v55, %v576_v43  ;;  %v593_v59 = vsub.f32 %v1149_v54, %v576_v43  ;;  %v995_v54 = vld [vmem:[%s1208_s4] ss:$0 sm:$0xff] }
  0xdf   : > { %v594_v60 = vsub.f32 %v1153_v56, %v576_v43  ;;  %v595_v61 = vsub.f32 %v1166_v8, %v576_v43  ;;  %v596_v62 = vsub.f32 %v1163_v3, %v576_v43  ;;  %v597_v1 = vsub.f32 %v1168_v9, %v576_v43 }
  0xe0   : > { %v579_v46 = vsub.f32 %v577_v44, %v578_v45  ;;  %v598_v2 = vsub.f32 %v538_v15, %v576_v43  ;;  %v599_v4 = vsub.f32 %v540_v22, %v576_v43 }
  0xe2   : > { %v580_v47 = vmax.f32 %v579_v46, 0.0 }
  0xe4   : > { %v581_v48 = vadd.f32 1e-05, %v580_v47 }
  0xe6   : > { %996 = vrsqrt.f32 %v581_v48  ;;  %vm588_vm1 = vweird.f32 %v581_v48 }
  0xec   : > { %v997_v49 = vpop.eup %996 }
  0xed   : > { %v583_v50 = vmul.f32 %v997_v49, %v581_v48  ;;  %vm589_vm0 = vweird.f32 %v997_v49 }
  0xee   : > { %vm590_vm2 = vmor %vm588_vm1, %vm589_vm0 }
  0xef   : > { %v584_v51 = vmul.f32 %v997_v49, %v583_v50 }
  0xf1   : > { %v585_v52 = vmul.f32 0.5, %v584_v51 }
  0xf3   : > { %v586_v53 = vsub.f32 1.5, %v585_v52 }
  0xf5   : > { %v587_v57 = vmul.f32 %v997_v49, %v586_v53 }
  0xf7   : > { %v591_v0 = vsel %vm590_vm2, %v997_v49, %v587_v57 }
  0xf8   : > { %v600_v5 = vmul.f32 %v592_v58, %v591_v0  ;;  %v601_v55 = vmul.f32 %v593_v59, %v591_v0  ;;  %v602_v6 = vmul.f32 %v594_v60, %v591_v0  ;;  %v603_v7 = vmul.f32 %v595_v61, %v591_v0 }
  0xf9   : > { %v604_v56 = vmul.f32 %v596_v62, %v591_v0  ;;  %v605_v3 = vmul.f32 %v597_v1, %v591_v0  ;;  %v606_v8 = vmul.f32 %v598_v2, %v591_v0  ;;  %v607_v10 = vmul.f32 %v599_v4, %v591_v0 }
  0xfa   : > { %v612_v11 = vmul.f32 %v994_v63, %v600_v5  ;;  %v613_v12 = vmul.f32 %v994_v63, %v601_v55  ;;  %v614_v13 = vmul.f32 %v994_v63, %v602_v6  ;;  %v615_v14 = vmul.f32 %v994_v63, %v603_v7 }
  0xfb   : > { %v616_v9 = vmul.f32 %v994_v63, %v604_v56  ;;  %v617_v15 = vmul.f32 %v994_v63, %v605_v3  ;;  %v618_v16 = vmul.f32 %v994_v63, %v606_v8  ;;  %v619_v17 = vmul.f32 %v994_v63, %v607_v10 }
  0xfc   : > { %v624_v18 = vadd.f32 %v995_v54, %v612_v11  ;;  %v625_v19 = vadd.f32 %v995_v54, %v613_v12  ;;  %v626_v20 = vadd.f32 %v995_v54, %v614_v13  ;;  %v627_v21 = vadd.f32 %v995_v54, %v615_v14 }
  0xfd   : > { %v628_v22 = vadd.f32 %v995_v54, %v616_v9  ;;  %v629_v23 = vadd.f32 %v995_v54, %v617_v15  ;;  %v630_v24 = vadd.f32 %v995_v54, %v618_v16  ;;  %v631_v25 = vadd.f32 %v995_v54, %v619_v17 }
  0xfe   : > { %v632_v26 = vmul.f32 0.2, %v624_v18  ;;  %v633_v27 = vmul.f32 0.2, %v625_v19  ;;  %v634_v28 = vmul.f32 0.2, %v626_v20 }
  0xff   : > { %v635_v29 = vmul.f32 0.2, %v627_v21  ;;  %v636_v30 = vmul.f32 0.2, %v628_v22  ;;  %v637_v31 = vmul.f32 0.2, %v629_v23 }
 0x100   : > { %v638_v32 = vmul.f32 0.2, %v630_v24  ;;  %v639_v33 = vmul.f32 0.2, %v631_v25  ;;  %v640_v34 = vmax.f32 %v624_v18, %v632_v26  ;;  %v641_v35 = vmax.f32 %v625_v19, %v633_v27 }
 0x101   : > { %v642_v36 = vmax.f32 %v626_v20, %v634_v28  ;;  %v643_v37 = vmax.f32 %v627_v21, %v635_v29  ;;  %v644_v38 = vmax.f32 %v628_v22, %v636_v30  ;;  %v645_v39 = vmax.f32 %v629_v23, %v637_v31 }
 0x102   : > { %v646_v40 = vmax.f32 %v630_v24, %v638_v32  ;;  %v647_v41 = vmax.f32 %v631_v25, %v639_v33  ;;  %v933_v42 = vpack.c.bf16 %v641_v35, %v640_v34 }
 0x103   : > { %v938_v43 = vpack.c.bf16 %v643_v37, %v642_v36  ;;  %v943_v44 = vpack.c.bf16 %v645_v39, %v644_v38 }
 0x104   : > { %934 = vst [vmem:[%s303_s25] sm:$0xff] %v933_v42   ;;  %v948_v45 = vpack.c.bf16 %v647_v41, %v646_v40 }
 0x105   : > { %950 = vst [vmem:[%s303_s25 + $0x8] sm:$0xff] %v938_v43  }
 0x106   : > { %951 = vst [vmem:[%s303_s25 + $0x10] sm:$0xff] %v943_v44  }
 0x107   : > { %952 = vst [vmem:[%s303_s25 + $0x18] sm:$0xff] %v948_v45  }
 0x108 PF: > { %s15_s20 = sadd.s32 1, %s1020_s20   ;;  %s1210_s18 = smov %s1016_s19 }
 0x109   : > { %p12_p5 = scmp.ge.s32.totalorder %s15_s20, 4   ;;  %s1211_s19 = smov %s1213_s21 }
 0x10b   :  { %14 = sbr.rel (!%p12_p5) target bundleno = 2 (0x2), region = 82 }

// kernel: discriminator_forward.7
= control target key start
LH: loop header
LB: loop body
LE: loop exit
PB: predicated region body
PF: predicated region fallthrough
CT: control target
= control target key end

     0   :  { %s1114_s18 = smov 0   ;;  %s1116_s19 = smov 0   ;;  %s1260_s0 = inlined_call_operand.vmem [shape: bf16[2,16,512], index: 0, kind: input, shape index: {}]   ;;  %s1261_s1 = inlined_call_operand.vmem [shape: bf16[512,128], index: 1, kind: input, shape index: {}]   ;;  %s1262_s2 = inlined_call_operand.vmem [shape: f32[1,128], index: 2, kind: input, shape index: {}]   ;;  %s1263_s3 = inlined_call_operand.vmem [shape: f32[1,128], index: 3, kind: input, shape index: {}]   ;;  %s1264_s4 = inlined_call_operand.vmem [shape: f32[1,128], index: 4, kind: input, shape index: {}]   ;;  %s1265_s5 = inlined_call_operand.vmem [shape: bf16[2,16,128], index: 5, kind: output, shape index: {}]  }
   0x1   :  { %s1118_s20 = smov 0  }
   0x2 LB: > { %s27_s21 = sadd.s32 1, %s1078_s19  ;;  %p837_p0 = scmp.ge.s32.totalorder %s1082_s20, 1  ;;  %s1082_s20 = sphi %s1118_s20, %s15_s20   ;;  %s1078_s19 = sphi %s1116_s19, %s1267_s19   ;;  %s1074_s18 = sphi %s1114_s18, %s1266_s18  }
   0x3   : > { %p29_p1 = scmp.ge.s32.totalorder %s27_s21, 2  ;;  %p234_p2 = scmp.lt.s32.totalorder %s1082_s20, 3 }
   0x5   : > { %s1269_s21 = smov (%p29_p1, %s27_s21), 0  ;;  %p235_p3 = pnand %p837_p0, %p234_p2 }
   0x6   : > { %p278_p4 = scmp.lt.s32.totalorder (!%p235_p3), %s1074_s18, 1 }
   0x7   : > { %238 = sbr.rel (%p235_p3) target bundleno = 245 (0xf5), region = 40 }
   0xc   : > { %v1001_v0 = vld [vmem:[%s1261_s1 + $0x38] sm:$0xff]  ;;  %v1000_v4 = vld [vmem:[%s1261_s1 + $0x30] sm:$0xff]  ;;  %v999_v8 = vld [vmem:[%s1261_s1 + $0x28] sm:$0xff]  ;;  %s1271_s18 = smov (!%p278_p4, %s1074_s18), 1 }
   0xd   : > { %v1009_v1 = vld [vmem:[%s1261_s1 + $0x78] sm:$0xff]  ;;  %588 = vmatpush.bf16.msra.mxu0 %v1001_v0  ;;  %v1008_v5 = vld [vmem:[%s1261_s1 + $0x70] sm:$0xff]  ;;  %v1007_v9 = vld [vmem:[%s1261_s1 + $0x68] sm:$0xff]  ;;  %s988_s28 = sshll.u32 %s1271_s18, 5  ;;  %s989_s8 = sshll.u32 %s1271_s18, 3 }
   0xe   : > { %v1017_v2 = vld [vmem:[%s1261_s1 + $0xb8] sm:$0xff]  ;;  %602 = vmatpush.bf16.msra.mxu1 %v1009_v1  ;;  %v1016_v6 = vld [vmem:[%s1261_s1 + $0xb0] sm:$0xff]  ;;  %v1015_v10 = vld [vmem:[%s1261_s1 + $0xa8] sm:$0xff]  ;;  %s282_s10 = scalar_lea.vmem %s1260_s0, %s988_s28  ;;  %s303_s11 = scalar_lea.vmem %s1265_s5, %s989_s8 }
   0xf   : > { %v1025_v3 = vld [vmem:[%s1261_s1 + $0xf8] sm:$0xff]  ;;  %616 = vmatpush.bf16.msra.mxu2 %v1017_v2  ;;  %v1024_v7 = vld [vmem:[%s1261_s1 + $0xf0] sm:$0xff]  ;;  %v1023_v11 = vld [vmem:[%s1261_s1 + $0xe8] sm:$0xff] }
  0x10   : > { %630 = vmatpush.bf16.msra.mxu3 %v1025_v3  ;;  %v998_v12 = vld [vmem:[%s1261_s1 + $0x20] sm:$0xff]  ;;  %v997_v16 = vld [vmem:[%s1261_s1 + $0x18] sm:$0xff]  ;;  %v996_v20 = vld [vmem:[%s1261_s1 + $0x10] sm:$0xff] }
  0x11   : > { %589 = vmatpush.bf16.msra.mxu0 %v1000_v4  ;;  %v1006_v13 = vld [vmem:[%s1261_s1 + $0x60] sm:$0xff]  ;;  %v1005_v17 = vld [vmem:[%s1261_s1 + $0x58] sm:$0xff]  ;;  %v1004_v21 = vld [vmem:[%s1261_s1 + $0x50] sm:$0xff] }
  0x12   : > { %603 = vmatpush.bf16.msra.mxu1 %v1008_v5  ;;  %v1014_v14 = vld [vmem:[%s1261_s1 + $0xa0] sm:$0xff]  ;;  %v1013_v18 = vld [vmem:[%s1261_s1 + $0x98] sm:$0xff]  ;;  %v1012_v22 = vld [vmem:[%s1261_s1 + $0x90] sm:$0xff] }
  0x13   : > { %617 = vmatpush.bf16.msra.mxu2 %v1016_v6  ;;  %v1022_v15 = vld [vmem:[%s1261_s1 + $0xe0] sm:$0xff]  ;;  %v1021_v19 = vld [vmem:[%s1261_s1 + $0xd8] sm:$0xff]  ;;  %v1020_v23 = vld [vmem:[%s1261_s1 + $0xd0] sm:$0xff] }
  0x14   : > { %631 = vmatpush.bf16.msra.mxu3 %v1024_v7  ;;  %v995_v24 = vld [vmem:[%s1261_s1 + $0x8] sm:$0xff]  ;;  %v994_v28 = vld [vmem:[%s1261_s1] sm:$0xff]  ;;  %v992_v33 = vld [vmem:[%s282_s10 + $0xc] sm:$0xf0] }
  0x15   : > { %590 = vmatpush.bf16.msra.mxu0 %v999_v8  ;;  %v1003_v25 = vld [vmem:[%s1261_s1 + $0x48] sm:$0xff]  ;;  %v1002_v29 = vld [vmem:[%s1261_s1 + $0x40] sm:$0xff]  ;;  %v846_v35 = vld [vmem:[%s282_s10 + $0x10] sm:$0xf0] }
  0x16   : > { %604 = vmatpush.bf16.msra.mxu1 %v1007_v9  ;;  %v1011_v26 = vld [vmem:[%s1261_s1 + $0x88] sm:$0xff]  ;;  %v1010_v30 = vld [vmem:[%s1261_s1 + $0x80] sm:$0xff]  ;;  %v993_v37 = vld [vmem:[%s282_s10 + $0x14] sm:$0xf0] }
  0x17   : > { %618 = vmatpush.bf16.msra.mxu2 %v1015_v10  ;;  %v1019_v27 = vld [vmem:[%s1261_s1 + $0xc8] sm:$0xff]  ;;  %v1018_v31 = vld [vmem:[%s1261_s1 + $0xc0] sm:$0xff]  ;;  %v854_v39 = vld [vmem:[%s282_s10 + $0x18] sm:$0xf0] }
  0x18   : > { %632 = vmatpush.bf16.msra.mxu3 %v1023_v11  ;;  %v844_v32 = vld [vmem:[%s282_s10] sm:$0xf]  ;;  %v990_v34 = vld [vmem:[%s282_s10 + $0x4] sm:$0xf]  ;;  %v852_v36 = vld [vmem:[%s282_s10 + $0x8] sm:$0xf] }
  0x19   : > { %591 = vmatpush.bf16.msra.mxu0 %v998_v12  ;;  %v991_v38 = vld [vmem:[%s282_s10 + $0xc] sm:$0xf]  ;;  %v845_v40 = vor.u32 %v992_v33, %v844_v32  ;;  %v849_v41 = vor.u32 %v990_v34, %v846_v35  ;;  %v853_v42 = vor.u32 %v993_v37, %v852_v36  ;;  %v1055_v44 = vld [vmem:[%s1262_s2] ss:$0 sm:$0xff] }
  0x1a   : > { %605 = vmatpush.bf16.msra.mxu1 %v1006_v13  ;;  %v857_v43 = vor.u32 %v991_v38, %v854_v39 }
  0x1b   : > { %619 = vmatpush.bf16.msra.mxu2 %v1014_v14 }
  0x1c   : > { %633 = vmatpush.bf16.msra.mxu3 %v1022_v15 }
  0x1d   : > { %592 = vmatpush.bf16.msra.mxu0 %v997_v16 }
  0x1e   : > { %606 = vmatpush.bf16.msra.mxu1 %v1005_v17 }
  0x1f   : > { %620 = vmatpush.bf16.msra.mxu2 %v1013_v18 }
  0x20   : > { %634 = vmatpush.bf16.msra.mxu3 %v1021_v19 }
  0x21   : > { %593 = vmatpush.bf16.msra.mxu0 %v996_v20 }
  0x22   : > { %607 = vmatpush.bf16.msra.mxu1 %v1004_v21 }
  0x23   : > { %621 = vmatpush.bf16.msra.mxu2 %v1012_v22 }
  0x24   : > { %635 = vmatpush.bf16.msra.mxu3 %v1020_v23 }
  0x25   : > { %594 = vmatpush.bf16.msra.mxu0 %v995_v24 }
  0x26   : > { %608 = vmatpush.bf16.msra.mxu1 %v1003_v25 }
  0x27   : > { %622 = vmatpush.bf16.msra.mxu2 %v1011_v26 }
  0x28   : > { %636 = vmatpush.bf16.msra.mxu3 %v1019_v27  ;;  %v1056_v27 = vld [vmem:[%s1263_s3] ss:$0 sm:$0xff] }
  0x29   : > { %595 = vmatpush.bf16.msra.mxu0 %v994_v28 }
  0x2a   : > { %609 = vmatpush.bf16.msra.mxu1 %v1002_v29 }
  0x2b   : > { %623 = vmatpush.bf16.msra.mxu2 %v1010_v30 }
  0x2c   : > { %637 = vmatpush.bf16.msra.mxu3 %v1018_v31  ;;  %596 = vmatmul.bf16.vlgmr.msra.gmra.mxu0 %v845_v40  ;;  %v1057_v31 = vld [vmem:[%s1264_s4] ss:$0 sm:$0xff] }
  0x2d   : > { %610 = vmatmul.bf16.vlgmr.msra.gmra.mxu1 %v849_v41 }
  0x2e   : > { %624 = vmatmul.bf16.vlgmr.msra.gmra.mxu2 %v853_v42 }
  0x2f   : > { %638 = vmatmul.bf16.vlgmr.msra.gmra.mxu3 %v857_v43 }
  0xa9   : > { %v597_v45 = vpop.f32.mrf.mxu0 }
  0xaa   : > { %v611_v46 = vpop.f32.mrf.mxu1  ;;  %v598_v47 = vadd.f32 %v1055_v44, %v597_v45 }
  0xac   : > { %v612_v50 = vadd.f32 %v611_v46, %v598_v47 }
  0xb1   : > { %v625_v48 = vpop.f32.mrf.mxu2  ;;  %v599_v51 = vpop.f32.mrf.mxu0 }
  0xb2   : > { %v639_v49 = vpop.f32.mrf.mxu3  ;;  %v600_v52 = vadd.f32 %v1055_v44, %v599_v51  ;;  %v626_v53 = vadd.f32 %v625_v48, %v612_v50  ;;  %v613_v54 = vpop.f32.mrf.mxu1 }
  0xb4   : > { %v614_v55 = vadd.f32 %v613_v54, %v600_v52  ;;  %v640_v57 = vadd.f32 %v639_v49, %v626_v53 }
  0xb6   : > { %v651_v61 = vmul.f32 %v640_v57, %v640_v57 }
  0xb9   : > { %v627_v56 = vpop.f32.mrf.mxu2 }
  0xba   : > { %v628_v58 = vadd.f32 %v627_v56, %v614_v55  ;;  %v641_v59 = vpop.f32.mrf.mxu3 }
  0xbc   : > { %v642_v60 = vadd.f32 %v641_v59, %v628_v58 }
  0xbe   : > { %v644_v62 = vadd.f32 %v642_v60, %v640_v57  ;;  %v652_v63 = vmul.f32 %v642_v60, %v642_v60 }
  0xc0   : > { %v645_v0 = vrot.slane %v644_v62, 4  ;;  %v653_v1 = vadd.f32 %v652_v63, %v651_v61 }
  0xc2   : > { %v646_v2 = vadd.f32 %v645_v0, %v644_v62  ;;  %v654_v3 = vrot.slane %v653_v1, 4 }
  0xc4   : > { %v647_v4 = vrot.slane %v646_v2, 2  ;;  %v655_v5 = vadd.f32 %v654_v3, %v653_v1 }
  0xc6   : > { %v648_v6 = vadd.f32 %v647_v4, %v646_v2  ;;  %v656_v7 = vrot.slane %v655_v5, 2 }
  0xc8   : > { %v649_v8 = vrot.slane %v648_v6, 1  ;;  %v657_v9 = vadd.f32 %v656_v7, %v655_v5 }
  0xca   : > { %v650_v10 = vadd.f32 %v649_v8, %v648_v6  ;;  %v658_v11 = vrot.slane %v657_v9, 1 }
  0xcc   : > { %v659_v12 = vadd.f32 %v658_v11, %v657_v9  ;;  %v660_v13 = vmul.f32 0.0625, %v650_v10 }
  0xce   : > { %v661_v14 = vmul.f32 0.0625, %v659_v12  ;;  %v662_v15 = vmul.f32 %v660_v13, %v660_v13  ;;  %v676_v25 = vsub.f32 %v640_v57, %v660_v13  ;;  %v677_v26 = vsub.f32 %v642_v60, %v660_v13 }
  0xd0   : > { %v663_v16 = vsub.f32 %v661_v14, %v662_v15 }
  0xd2   : > { %v664_v17 = vmax.f32 %v663_v16, 0.0 }
  0xd4   : > { %v665_v18 = vadd.f32 1e-05, %v664_v17 }
  0xd6   : > { %1058 = vrsqrt.f32 %v665_v18  ;;  %vm672_vm1 = vweird.f32 %v665_v18 }
  0xdc   : > { %v1059_v19 = vpop.eup %1058 }
  0xdd   : > { %v667_v20 = vmul.f32 %v1059_v19, %v665_v18  ;;  %vm673_vm0 = vweird.f32 %v1059_v19 }
  0xde   : > { %vm674_vm2 = vmor %vm672_vm1, %vm673_vm0 }
  0xdf   : > { %v668_v21 = vmul.f32 %v1059_v19, %v667_v20 }
  0xe1   : > { %v669_v22 = vmul.f32 0.5, %v668_v21 }
  0xe3   : > { %v670_v23 = vsub.f32 1.5, %v669_v22 }
  0xe5   : > { %v671_v24 = vmul.f32 %v1059_v19, %v670_v23 }
  0xe7   : > { %v675_v28 = vsel %vm674_vm2, %v1059_v19, %v671_v24 }
  0xe8   : > { %v678_v29 = vmul.f32 %v676_v25, %v675_v28  ;;  %v679_v30 = vmul.f32 %v677_v26, %v675_v28 }
  0xea   : > { %v684_v32 = vmul.f32 %v1056_v27, %v678_v29  ;;  %v685_v33 = vmul.f32 %v1056_v27, %v679_v30 }
  0xec   : > { %v690_v34 = vadd.f32 %v1057_v31, %v684_v32  ;;  %v691_v35 = vadd.f32 %v1057_v31, %v685_v33 }
  0xee   : > { %v692_v36 = vmul.f32 0.2, %v690_v34  ;;  %v693_v37 = vmul.f32 0.2, %v691_v35 }
  0xf0   : > { %v694_v38 = vmax.f32 %v690_v34, %v692_v36  ;;  %v695_v39 = vmax.f32 %v691_v35, %v693_v37 }
  0xf2   : > { %v1029_v40 = vpack.c.bf16 %v695_v39, %v694_v38 }
  0xf4   : > { %1030 = vst [vmem:[%s303_s11] sm:$0xff] %v1029_v40  }
  0xf5 PF: > { %s15_s20 = sadd.s32 1, %s1082_s20   ;;  %s1266_s18 = smov %s1078_s19 }
  0xf6   : > { %p12_p5 = scmp.ge.s32.totalorder %s15_s20, 4   ;;  %s1267_s19 = smov %s1269_s21 }
  0xf8   :  { %14 = sbr.rel (!%p12_p5) target bundleno = 2 (0x2), region = 82 }

// kernel: discriminator_forward.8
= control target key start
LH: loop header
LB: loop body
LE: loop exit
PB: predicated region body
PF: predicated region fallthrough
CT: control target
= control target key end

     0   :  { %s1630_s18 = smov 0   ;;  %s1632_s19 = smov 0   ;;  %s1890_s0 = inlined_call_operand.vmem [shape: bf16[2,16,1024], index: 0, kind: input, shape index: {}]   ;;  %s1891_s1 = inlined_call_operand.vmem [shape: bf16[1024,128], index: 1, kind: input, shape index: {}]   ;;  %s1892_s2 = inlined_call_operand.vmem [shape: f32[1,128], index: 2, kind: input, shape index: {}]   ;;  %s1893_s3 = inlined_call_operand.vmem [shape: f32[1,128], index: 3, kind: input, shape index: {}]   ;;  %s1894_s4 = inlined_call_operand.vmem [shape: f32[1,128], index: 4, kind: input, shape index: {}]   ;;  %s1895_s5 = inlined_call_operand.vmem [shape: bf16[2,16,128], index: 5, kind: output, shape index: {}]  }
   0x1   :  { %s1634_s20 = smov 0  }
   0x2 LB: > { %s27_s21 = sadd.s32 1, %s1594_s19  ;;  %p1173_p0 = scmp.ge.s32.totalorder %s1598_s20, 1  ;;  %s1598_s20 = sphi %s1634_s20, %s15_s20   ;;  %s1594_s19 = sphi %s1632_s19, %s1897_s19   ;;  %s1590_s18 = sphi %s1630_s18, %s1896_s18  }
   0x3   : > { %p29_p1 = scmp.ge.s32.totalorder %s27_s21, 2  ;;  %p234_p2 = scmp.lt.s32.totalorder %s1598_s20, 3 }
   0x5   : > { %s1899_s21 = smov (%p29_p1, %s27_s21), 0  ;;  %p235_p3 = pnand %p1173_p0, %p234_p2 }
   0x6   : > { %p278_p4 = scmp.lt.s32.totalorder (!%p235_p3), %s1590_s18, 1 }
   0x7   : > { %238 = sbr.rel (%p235_p3) target bundleno = 277 (0x115), region = 40 }
   0xc   : > { %v1485_v0 = vld [vmem:[%s1891_s1 + $0x38] sm:$0xff]  ;;  %v1484_v4 = vld [vmem:[%s1891_s1 + $0x30] sm:$0xff]  ;;  %v1483_v8 = vld [vmem:[%s1891_s1 + $0x28] sm:$0xff]  ;;  %s1901_s18 = smov (!%p278_p4, %s1590_s18), 1 }
   0xd   : > { %v1493_v1 = vld [vmem:[%s1891_s1 + $0x78] sm:$0xff]  ;;  %868 = vmatpush.bf16.msra.mxu0 %v1485_v0  ;;  %v1492_v5 = vld [vmem:[%s1891_s1 + $0x70] sm:$0xff]  ;;  %v1491_v9 = vld [vmem:[%s1891_s1 + $0x68] sm:$0xff]  ;;  %s1468_s28 = sshll.u32 %s1901_s18, 6  ;;  %s1469_s11 = sshll.u32 %s1901_s18, 3 }
   0xe   : > { %v1501_v2 = vld [vmem:[%s1891_s1 + $0xb8] sm:$0xff]  ;;  %882 = vmatpush.bf16.msra.mxu1 %v1493_v1  ;;  %v1500_v6 = vld [vmem:[%s1891_s1 + $0xb0] sm:$0xff]  ;;  %v1499_v10 = vld [vmem:[%s1891_s1 + $0xa8] sm:$0xff]  ;;  %s1742_s14 = scalar_lea.vmem %s1890_s0, %s1468_s28  ;;  %s303_s15 = scalar_lea.vmem %s1895_s5, %s1469_s11 }
   0xf   : > { %v1509_v3 = vld [vmem:[%s1891_s1 + $0xf8] sm:$0xff]  ;;  %896 = vmatpush.bf16.msra.mxu2 %v1501_v2  ;;  %v1508_v7 = vld [vmem:[%s1891_s1 + $0xf0] sm:$0xff]  ;;  %v1507_v11 = vld [vmem:[%s1891_s1 + $0xe8] sm:$0xff] }
  0x10   : > { %910 = vmatpush.bf16.msra.mxu3 %v1509_v3  ;;  %v1482_v12 = vld [vmem:[%s1891_s1 + $0x20] sm:$0xff]  ;;  %v1481_v16 = vld [vmem:[%s1891_s1 + $0x18] sm:$0xff]  ;;  %v1480_v20 = vld [vmem:[%s1891_s1 + $0x10] sm:$0xff] }
  0x11   : > { %869 = vmatpush.bf16.msra.mxu0 %v1484_v4  ;;  %v1490_v13 = vld [vmem:[%s1891_s1 + $0x60] sm:$0xff]  ;;  %v1489_v17 = vld [vmem:[%s1891_s1 + $0x58] sm:$0xff]  ;;  %v1488_v21 = vld [vmem:[%s1891_s1 + $0x50] sm:$0xff] }
  0x12   : > { %883 = vmatpush.bf16.msra.mxu1 %v1492_v5  ;;  %v1498_v14 = vld [vmem:[%s1891_s1 + $0xa0] sm:$0xff]  ;;  %v1497_v18 = vld [vmem:[%s1891_s1 + $0x98] sm:$0xff]  ;;  %v1496_v22 = vld [vmem:[%s1891_s1 + $0x90] sm:$0xff] }
  0x13   : > { %897 = vmatpush.bf16.msra.mxu2 %v1500_v6  ;;  %v1506_v15 = vld [vmem:[%s1891_s1 + $0xe0] sm:$0xff]  ;;  %v1505_v19 = vld [vmem:[%s1891_s1 + $0xd8] sm:$0xff]  ;;  %v1504_v23 = vld [vmem:[%s1891_s1 + $0xd0] sm:$0xff] }
  0x14   : > { %911 = vmatpush.bf16.msra.mxu3 %v1508_v7  ;;  %v1479_v24 = vld [vmem:[%s1891_s1 + $0x8] sm:$0xff]  ;;  %v1478_v28 = vld [vmem:[%s1891_s1] sm:$0xff]  ;;  %v1517_v32 = vld [vmem:[%s1891_s1 + $0x138] sm:$0xff] }
  0x15   : > { %870 = vmatpush.bf16.msra.mxu0 %v1483_v8  ;;  %v1487_v25 = vld [vmem:[%s1891_s1 + $0x48] sm:$0xff]  ;;  %v1486_v29 = vld [vmem:[%s1891_s1 + $0x40] sm:$0xff]  ;;  %v1525_v33 = vld [vmem:[%s1891_s1 + $0x178] sm:$0xff] }
  0x16   : > { %884 = vmatpush.bf16.msra.mxu1 %v1491_v9  ;;  %v1495_v26 = vld [vmem:[%s1891_s1 + $0x88] sm:$0xff]  ;;  %v1494_v30 = vld [vmem:[%s1891_s1 + $0x80] sm:$0xff]  ;;  %v1533_v42 = vld [vmem:[%s1891_s1 + $0x1b8] sm:$0xff] }
  0x17   : > { %898 = vmatpush.bf16.msra.mxu2 %v1499_v10  ;;  %v1503_v27 = vld [vmem:[%s1891_s1 + $0xc8] sm:$0xff]  ;;  %v1502_v31 = vld [vmem:[%s1891_s1 + $0xc0] sm:$0xff]  ;;  %v1541_v43 = vld [vmem:[%s1891_s1 + $0x1f8] sm:$0xff] }
  0x18   : > { %912 = vmatpush.bf16.msra.mxu3 %v1507_v11  ;;  %v1188_v34 = vld [vmem:[%s1742_s14 + $0x8] sm:$0xf]  ;;  %v1180_v36 = vld [vmem:[%s1742_s14] sm:$0xf]  ;;  %v1471_v38 = vld [vmem:[%s1742_s14 + $0xc] sm:$0xf] }
  0x19   : > { %871 = vmatpush.bf16.msra.mxu0 %v1482_v12  ;;  %v1475_v35 = vld [vmem:[%s1742_s14 + $0x24] sm:$0xf0]  ;;  %v1474_v37 = vld [vmem:[%s1742_s14 + $0x1c] sm:$0xf0]  ;;  %v1190_v39 = vld [vmem:[%s1742_s14 + $0x28] sm:$0xf0] }
  0x1a   : > { %885 = vmatpush.bf16.msra.mxu1 %v1490_v13  ;;  %v1470_v40 = vld [vmem:[%s1742_s14 + $0x4] sm:$0xf]  ;;  %v1189_v44 = vor.u32 %v1475_v35, %v1188_v34  ;;  %v1181_v45 = vor.u32 %v1474_v37, %v1180_v36  ;;  %v1193_v46 = vor.u32 %v1471_v38, %v1190_v39  ;;  %v1516_v48 = vld [vmem:[%s1891_s1 + $0x130] sm:$0xff]  ;;  %v1515_v52 = vld [vmem:[%s1891_s1 + $0x128] sm:$0xff] }
  0x1b   : > { %899 = vmatpush.bf16.msra.mxu2 %v1498_v14  ;;  %v1182_v41 = vld [vmem:[%s1742_s14 + $0x20] sm:$0xf0]  ;;  %v1524_v49 = vld [vmem:[%s1891_s1 + $0x170] sm:$0xff]  ;;  %v1523_v53 = vld [vmem:[%s1891_s1 + $0x168] sm:$0xff] }
  0x1c   : > { %913 = vmatpush.bf16.msra.mxu3 %v1506_v15  ;;  %v1185_v47 = vor.u32 %v1470_v40, %v1182_v41  ;;  %v1532_v50 = vld [vmem:[%s1891_s1 + $0x1b0] sm:$0xff]  ;;  %v1531_v54 = vld [vmem:[%s1891_s1 + $0x1a8] sm:$0xff]  ;;  %v1514_v56 = vld [vmem:[%s1891_s1 + $0x120] sm:$0xff] }
  0x1d   : > { %872 = vmatpush.bf16.msra.mxu0 %v1481_v16  ;;  %v1540_v51 = vld [vmem:[%s1891_s1 + $0x1f0] sm:$0xff]  ;;  %v1539_v55 = vld [vmem:[%s1891_s1 + $0x1e8] sm:$0xff]  ;;  %v1522_v57 = vld [vmem:[%s1891_s1 + $0x160] sm:$0xff] }
  0x1e   : > { %886 = vmatpush.bf16.msra.mxu1 %v1489_v17  ;;  %v1530_v58 = vld [vmem:[%s1891_s1 + $0x1a0] sm:$0xff]  ;;  %v1513_v60 = vld [vmem:[%s1891_s1 + $0x118] sm:$0xff]  ;;  %v1512_v0 = vld [vmem:[%s1891_s1 + $0x110] sm:$0xff] }
  0x1f   : > { %900 = vmatpush.bf16.msra.mxu2 %v1497_v18  ;;  %v1538_v59 = vld [vmem:[%s1891_s1 + $0x1e0] sm:$0xff]  ;;  %v1521_v61 = vld [vmem:[%s1891_s1 + $0x158] sm:$0xff]  ;;  %v1520_v1 = vld [vmem:[%s1891_s1 + $0x150] sm:$0xff] }
  0x20   : > { %914 = vmatpush.bf16.msra.mxu3 %v1505_v19  ;;  %v1529_v62 = vld [vmem:[%s1891_s1 + $0x198] sm:$0xff]  ;;  %v1528_v2 = vld [vmem:[%s1891_s1 + $0x190] sm:$0xff]  ;;  %v1511_v4 = vld [vmem:[%s1891_s1 + $0x108] sm:$0xff] }
  0x21   : > { %873 = vmatpush.bf16.msra.mxu0 %v1480_v20  ;;  %v1537_v63 = vld [vmem:[%s1891_s1 + $0x1d8] sm:$0xff]  ;;  %v1536_v3 = vld [vmem:[%s1891_s1 + $0x1d0] sm:$0xff]  ;;  %v1519_v5 = vld [vmem:[%s1891_s1 + $0x148] sm:$0xff] }
  0x22   : > { %887 = vmatpush.bf16.msra.mxu1 %v1488_v21  ;;  %v1527_v6 = vld [vmem:[%s1891_s1 + $0x188] sm:$0xff]  ;;  %v1510_v8 = vld [vmem:[%s1891_s1 + $0x100] sm:$0xff]  ;;  %v1196_v12 = vld [vmem:[%s1742_s14 + $0x10] sm:$0xf] }
  0x23   : > { %901 = vmatpush.bf16.msra.mxu2 %v1496_v22  ;;  %v1535_v7 = vld [vmem:[%s1891_s1 + $0x1c8] sm:$0xff]  ;;  %v1518_v9 = vld [vmem:[%s1891_s1 + $0x140] sm:$0xff]  ;;  %v1476_v13 = vld [vmem:[%s1742_s14 + $0x2c] sm:$0xf0] }
  0x24   : > { %915 = vmatpush.bf16.msra.mxu3 %v1504_v23  ;;  %v1526_v10 = vld [vmem:[%s1891_s1 + $0x180] sm:$0xff]  ;;  %v1472_v14 = vld [vmem:[%s1742_s14 + $0x14] sm:$0xf]  ;;  %v1204_v16 = vld [vmem:[%s1742_s14 + $0x18] sm:$0xf]  ;;  %v1197_v20 = vor.u32 %v1476_v13, %v1196_v12 }
  0x25   : > { %874 = vmatpush.bf16.msra.mxu0 %v1479_v24  ;;  %v1534_v11 = vld [vmem:[%s1891_s1 + $0x1c0] sm:$0xff]  ;;  %v1198_v15 = vld [vmem:[%s1742_s14 + $0x30] sm:$0xf0]  ;;  %v1477_v17 = vld [vmem:[%s1742_s14 + $0x34] sm:$0xf0] }
  0x26   : > { %888 = vmatpush.bf16.msra.mxu1 %v1487_v25  ;;  %v1473_v18 = vld [vmem:[%s1742_s14 + $0x1c] sm:$0xf]  ;;  %v1201_v21 = vor.u32 %v1472_v14, %v1198_v15  ;;  %v1205_v22 = vor.u32 %v1477_v17, %v1204_v16 }
  0x27   : > { %902 = vmatpush.bf16.msra.mxu2 %v1495_v26  ;;  %v1206_v19 = vld [vmem:[%s1742_s14 + $0x38] sm:$0xf0]  ;;  %v1571_v26 = vld [vmem:[%s1892_s2] ss:$0 sm:$0xff] }
  0x28   : > { %916 = vmatpush.bf16.msra.mxu3 %v1503_v27  ;;  %v1209_v23 = vor.u32 %v1473_v18, %v1206_v19 }
  0x29   : > { %875 = vmatpush.bf16.msra.mxu0 %v1478_v28 }
  0x2a   : > { %889 = vmatpush.bf16.msra.mxu1 %v1486_v29 }
  0x2b   : > { %903 = vmatpush.bf16.msra.mxu2 %v1494_v30 }
  0x2c   : > { %917 = vmatpush.bf16.msra.mxu3 %v1502_v31  ;;  %876 = vmatmul.bf16.vlgmr.msra.gmra.mxu0 %v1181_v45 }
  0x2d   : > { %924 = vmatpush.bf16.msrb.mxu0 %v1517_v32  ;;  %890 = vmatmul.bf16.vlgmr.msra.gmra.mxu1 %v1185_v47 }
  0x2e   : > { %938 = vmatpush.bf16.msrb.mxu1 %v1525_v33  ;;  %904 = vmatmul.bf16.vlgmr.msra.gmra.mxu2 %v1189_v44 }
  0x2f   : > { %952 = vmatpush.bf16.msrb.mxu2 %v1533_v42  ;;  %918 = vmatmul.bf16.vlgmr.msra.gmra.mxu3 %v1193_v46 }
  0x30   : > { %966 = vmatpush.bf16.msrb.mxu3 %v1541_v43 }
  0x31   : > { %925 = vmatpush.bf16.msrb.mxu0 %v1516_v48 }
  0x32   : > { %939 = vmatpush.bf16.msrb.mxu1 %v1524_v49 }
  0x33   : > { %953 = vmatpush.bf16.msrb.mxu2 %v1532_v50 }
  0x34   : > { %967 = vmatpush.bf16.msrb.mxu3 %v1540_v51 }
  0x35   : > { %926 = vmatpush.bf16.msrb.mxu0 %v1515_v52 }
  0x36   : > { %940 = vmatpush.bf16.msrb.mxu1 %v1523_v53 }
  0x37   : > { %954 = vmatpush.bf16.msrb.mxu2 %v1531_v54 }
  0x38   : > { %968 = vmatpush.bf16.msrb.mxu3 %v1539_v55 }
  0x39   : > { %927 = vmatpush.bf16.msrb.mxu0 %v1514_v56 }
  0x3a   : > { %941 = vmatpush.bf16.msrb.mxu1 %v1522_v57 }
  0x3b   : > { %955 = vmatpush.bf16.msrb.mxu2 %v1530_v58 }
  0x3c   : > { %969 = vmatpush.bf16.msrb.mxu3 %v1538_v59 }
  0x3d   : > { %928 = vmatpush.bf16.msrb.mxu0 %v1513_v60 }
  0x3e   : > { %942 = vmatpush.bf16.msrb.mxu1 %v1521_v61 }
  0x3f   : > { %956 = vmatpush.bf16.msrb.mxu2 %v1529_v62 }
  0x40   : > { %970 = vmatpush.bf16.msrb.mxu3 %v1537_v63 }
  0x41   : > { %929 = vmatpush.bf16.msrb.mxu0 %v1512_v0 }
  0x42   : > { %943 = vmatpush.bf16.msrb.mxu1 %v1520_v1 }
  0x43   : > { %957 = vmatpush.bf16.msrb.mxu2 %v1528_v2 }
  0x44   : > { %971 = vmatpush.bf16.msrb.mxu3 %v1536_v3 }
  0x45   : > { %930 = vmatpush.bf16.msrb.mxu0 %v1511_v4 }
  0x46   : > { %944 = vmatpush.bf16.msrb.mxu1 %v1519_v5 }
  0x47   : > { %958 = vmatpush.bf16.msrb.mxu2 %v1527_v6 }
  0x48   : > { %972 = vmatpush.bf16.msrb.mxu3 %v1535_v7 }
  0x49   : > { %931 = vmatpush.bf16.msrb.mxu0 %v1510_v8 }
  0x4a   : > { %945 = vmatpush.bf16.msrb.mxu1 %v1518_v9 }
  0x4b   : > { %959 = vmatpush.bf16.msrb.mxu2 %v1526_v10 }
  0x4c   : > { %973 = vmatpush.bf16.msrb.mxu3 %v1534_v11  ;;  %932 = vmatmul.bf16.vlgmr.msrb.gmra.mxu0 %v1197_v20 }
  0x4d   : > { %946 = vmatmul.bf16.vlgmr.msrb.gmra.mxu1 %v1201_v21 }
  0x4e   : > { %960 = vmatmul.bf16.vlgmr.msrb.gmra.mxu2 %v1205_v22 }
  0x4f   : > { %974 = vmatmul.bf16.vlgmr.msrb.gmra.mxu3 %v1209_v23  ;;  %v1572_v23 = vld [vmem:[%s1893_s3] ss:$0 sm:$0xff] }
  0xa9   : > { %v877_v24 = vpop.f32.mrf.mxu0 }
  0xaa   : > { %v891_v25 = vpop.f32.mrf.mxu1  ;;  %v878_v29 = vadd.f32 %v1571_v26, %v877_v24 }
  0xac   : > { %v892_v32 = vadd.f32 %v891_v25, %v878_v29 }
  0xb1   : > { %v905_v27 = vpop.f32.mrf.mxu2  ;;  %v879_v30 = vpop.f32.mrf.mxu0 }
  0xb2   : > { %v919_v28 = vpop.f32.mrf.mxu3  ;;  %v893_v31 = vpop.f32.mrf.mxu1  ;;  %v880_v33 = vadd.f32 %v1571_v26, %v879_v30  ;;  %v906_v36 = vadd.f32 %v905_v27, %v892_v32  ;;  %v1573_v27 = vld [vmem:[%s1894_s4] ss:$0 sm:$0xff] }
  0xb4   : > { %v894_v37 = vadd.f32 %v893_v31, %v880_v33  ;;  %v920_v40 = vadd.f32 %v919_v28, %v906_v36 }
  0xb9   : > { %v907_v34 = vpop.f32.mrf.mxu2 }
  0xba   : > { %v921_v35 = vpop.f32.mrf.mxu3  ;;  %v908_v41 = vadd.f32 %v907_v34, %v894_v37 }
  0xbc   : > { %v922_v45 = vadd.f32 %v921_v35, %v908_v41 }
  0xc9   : > { %v933_v38 = vpop.f32.mrf.mxu0 }
  0xca   : > { %v947_v39 = vpop.f32.mrf.mxu1  ;;  %v934_v42 = vadd.f32 %v933_v38, %v920_v40 }
  0xcc   : > { %v948_v47 = vadd.f32 %v947_v39, %v934_v42 }
  0xd1   : > { %v961_v43 = vpop.f32.mrf.mxu2  ;;  %v935_v46 = vpop.f32.mrf.mxu0 }
  0xd2   : > { %v975_v44 = vpop.f32.mrf.mxu3  ;;  %v936_v48 = vadd.f32 %v935_v46, %v922_v45  ;;  %v962_v49 = vadd.f32 %v961_v43, %v948_v47  ;;  %v949_v50 = vpop.f32.mrf.mxu1 }
  0xd4   : > { %v950_v51 = vadd.f32 %v949_v50, %v936_v48  ;;  %v976_v53 = vadd.f32 %v975_v44, %v962_v49 }
  0xd6   : > { %v987_v57 = vmul.f32 %v976_v53, %v976_v53 }
  0xd9   : > { %v963_v52 = vpop.f32.mrf.mxu2 }
  0xda   : > { %v964_v54 = vadd.f32 %v963_v52, %v950_v51  ;;  %v977_v55 = vpop.f32.mrf.mxu3 }
  0xdc   : > { %v978_v56 = vadd.f32 %v977_v55, %v964_v54 }
  0xde   : > { %v980_v58 = vadd.f32 %v978_v56, %v976_v53  ;;  %v988_v59 = vmul.f32 %v978_v56, %v978_v56 }
  0xe0   : > { %v981_v60 = vrot.slane %v980_v58, 4  ;;  %v989_v61 = vadd.f32 %v988_v59, %v987_v57 }
  0xe2   : > { %v982_v62 = vadd.f32 %v981_v60, %v980_v58  ;;  %v990_v63 = vrot.slane %v989_v61, 4 }
  0xe4   : > { %v983_v0 = vrot.slane %v982_v62, 2  ;;  %v991_v1 = vadd.f32 %v990_v63, %v989_v61 }
  0xe6   : > { %v984_v2 = vadd.f32 %v983_v0, %v982_v62  ;;  %v992_v3 = vrot.slane %v991_v1, 2 }
  0xe8   : > { %v985_v4 = vrot.slane %v984_v2, 1  ;;  %v993_v5 = vadd.f32 %v992_v3, %v991_v1 }
  0xea   : > { %v986_v6 = vadd.f32 %v985_v4, %v984_v2  ;;  %v994_v7 = vrot.slane %v993_v5, 1 }
  0xec   : > { %v995_v8 = vadd.f32 %v994_v7, %v993_v5  ;;  %v996_v9 = vmul.f32 0.11111111, %v986_v6 }
  0xee   : > { %v997_v10 = vmul.f32 0.11111111, %v995_v8  ;;  %v998_v11 = vmul.f32 %v996_v9, %v996_v9  ;;  %v1012_v21 = vsub.f32 %v976_v53, %v996_v9  ;;  %v1013_v22 = vsub.f32 %v978_v56, %v996_v9 }
  0xf0   : > { %v999_v12 = vsub.f32 %v997_v10, %v998_v11 }
  0xf2   : > { %v1000_v13 = vmax.f32 %v999_v12, 0.0 }
  0xf4   : > { %v1001_v14 = vadd.f32 1e-05, %v1000_v13 }
  0xf6   : > { %1574 = vrsqrt.f32 %v1001_v14  ;;  %vm1008_vm1 = vweird.f32 %v1001_v14 }
  0xfc   : > { %v1575_v15 = vpop.eup %1574 }
  0xfd   : > { %v1003_v16 = vmul.f32 %v1575_v15, %v1001_v14  ;;  %vm1009_vm0 = vweird.f32 %v1575_v15 }
  0xfe   : > { %vm1010_vm2 = vmor %vm1008_vm1, %vm1009_vm0 }
  0xff   : > { %v1004_v17 = vmul.f32 %v1575_v15, %v1003_v16 }
 0x101   : > { %v1005_v18 = vmul.f32 0.5, %v1004_v17 }
 0x103   : > { %v1006_v19 = vsub.f32 1.5, %v1005_v18 }
 0x105   : > { %v1007_v20 = vmul.f32 %v1575_v15, %v1006_v19 }
 0x107   : > { %v1011_v24 = vsel %vm1010_vm2, %v1575_v15, %v1007_v20 }
 0x108   : > { %v1014_v25 = vmul.f32 %v1012_v21, %v1011_v24  ;;  %v1015_v26 = vmul.f32 %v1013_v22, %v1011_v24 }
 0x10a   : > { %v1020_v28 = vmul.f32 %v1572_v23, %v1014_v25  ;;  %v1021_v29 = vmul.f32 %v1572_v23, %v1015_v26 }
 0x10c   : > { %v1026_v30 = vadd.f32 %v1573_v27, %v1020_v28  ;;  %v1027_v31 = vadd.f32 %v1573_v27, %v1021_v29 }
 0x10e   : > { %v1028_v32 = vmul.f32 0.2, %v1026_v30  ;;  %v1029_v33 = vmul.f32 0.2, %v1027_v31 }
 0x110   : > { %v1030_v34 = vmax.f32 %v1026_v30, %v1028_v32  ;;  %v1031_v35 = vmax.f32 %v1027_v31, %v1029_v33 }
 0x112   : > { %v1545_v36 = vpack.c.bf16 %v1031_v35, %v1030_v34 }
 0x114   : > { %1546 = vst [vmem:[%s303_s15] sm:$0xff] %v1545_v36  }
 0x115 PF: > { %s15_s20 = sadd.s32 1, %s1598_s20   ;;  %s1896_s18 = smov %s1594_s19 }
 0x116   : > { %p12_p5 = scmp.ge.s32.totalorder %s15_s20, 4   ;;  %s1897_s19 = smov %s1899_s21 }
 0x118   :  { %14 = sbr.rel (!%p12_p5) target bundleno = 2 (0x2), region = 82 }

// kernel: discriminator_forward.9
= control target key start
LH: loop header
LB: loop body
LE: loop exit
PB: predicated region body
PF: predicated region fallthrough
CT: control target
= control target key end

     0   :  { %s2460_s18 = smov 0   ;;  %s2462_s19 = smov 0   ;;  %s2898_s0 = inlined_call_operand.vmem [shape: bf16[2,8,2048], index: 0, kind: input, shape index: {}]   ;;  %s2899_s1 = inlined_call_operand.vmem [shape: bf16[2048,128], index: 1, kind: input, shape index: {}]   ;;  %s2900_s2 = inlined_call_operand.vmem [shape: f32[1,128], index: 2, kind: input, shape index: {}]   ;;  %s2901_s3 = inlined_call_operand.vmem [shape: f32[1,128], index: 3, kind: input, shape index: {}]   ;;  %s2902_s4 = inlined_call_operand.vmem [shape: f32[1,128], index: 4, kind: input, shape index: {}]   ;;  %s2903_s5 = inlined_call_operand.vmem [shape: f32[2,8,128], index: 5, kind: output, shape index: {}]  }
   0x1   :  { %s2464_s20 = smov 0  }
   0x2 LB: > { %s27_s3 = sadd.s32 1, %s2424_s19  ;;  %p1734_p0 = scmp.ge.s32.totalorder %s2428_s20, 1  ;;  %s2428_s20 = sphi %s2464_s20, %s15_s20   ;;  %s2424_s19 = sphi %s2462_s19, %s2905_s19   ;;  %s2420_s18 = sphi %s2460_s18, %s2904_s18  }
   0x3   : > { %p29_p1 = scmp.ge.s32.totalorder %s27_s3, 2  ;;  %p234_p2 = scmp.lt.s32.totalorder %s2428_s20, 3 }
   0x5   : > { %s2907_s3 = smov (%p29_p1, %s27_s3), 0  ;;  %p235_p3 = pnand %p1734_p0, %p234_p2 }
   0x6   : > { %p277_p4 = scmp.lt.s32.totalorder (!%p235_p3), %s2420_s18, 1 }
   0x7   : > { %238 = sbr.rel (%p235_p3) target bundleno = 283 (0x11b), region = 40 }
   0xc   : > { %v2260_v0 = vld [vmem:[%s2899_s1 + $0x38] sm:$0xff]  ;;  %v2259_v4 = vld [vmem:[%s2899_s1 + $0x30] sm:$0xff]  ;;  %v2258_v8 = vld [vmem:[%s2899_s1 + $0x28] sm:$0xff]  ;;  %s2909_s18 = smov (!%p277_p4, %s2420_s18), 1 }
   0xd   : > { %v2268_v1 = vld [vmem:[%s2899_s1 + $0x78] sm:$0xff]  ;;  %1394 = vmatpush.bf16.msra.mxu0 %v2260_v0  ;;  %v2267_v5 = vld [vmem:[%s2899_s1 + $0x70] sm:$0xff]  ;;  %v2266_v9 = vld [vmem:[%s2899_s1 + $0x68] sm:$0xff]  ;;  %s2252_s12 = sshll.u32 %s2909_s18, 6 }
   0xe   : > { %v2276_v2 = vld [vmem:[%s2899_s1 + $0xb8] sm:$0xff]  ;;  %1407 = vmatpush.bf16.msra.mxu1 %v2268_v1  ;;  %v2275_v6 = vld [vmem:[%s2899_s1 + $0xb0] sm:$0xff]  ;;  %v2274_v10 = vld [vmem:[%s2899_s1 + $0xa8] sm:$0xff]  ;;  %s2560_s25 = scalar_lea.vmem %s2898_s0, %s2252_s12  ;;  %s1737_s12 = sshll.u32 %s2909_s18, 3 }
   0xf   : > { %v2284_v3 = vld [vmem:[%s2899_s1 + $0xf8] sm:$0xff]  ;;  %1420 = vmatpush.bf16.msra.mxu2 %v2276_v2  ;;  %v2283_v7 = vld [vmem:[%s2899_s1 + $0xf0] sm:$0xff]  ;;  %v2282_v11 = vld [vmem:[%s2899_s1 + $0xe8] sm:$0xff]  ;;  %s301_s15 = scalar_lea.vmem %s2903_s5, %s1737_s12 }
  0x10   : > { %1433 = vmatpush.bf16.msra.mxu3 %v2284_v3  ;;  %v2257_v12 = vld [vmem:[%s2899_s1 + $0x20] sm:$0xff]  ;;  %v2256_v16 = vld [vmem:[%s2899_s1 + $0x18] sm:$0xff]  ;;  %v2255_v20 = vld [vmem:[%s2899_s1 + $0x10] sm:$0xff] }
  0x11   : > { %1395 = vmatpush.bf16.msra.mxu0 %v2259_v4  ;;  %v2265_v13 = vld [vmem:[%s2899_s1 + $0x60] sm:$0xff]  ;;  %v2264_v17 = vld [vmem:[%s2899_s1 + $0x58] sm:$0xff]  ;;  %v2263_v21 = vld [vmem:[%s2899_s1 + $0x50] sm:$0xff] }
  0x12   : > { %1408 = vmatpush.bf16.msra.mxu1 %v2267_v5  ;;  %v2273_v14 = vld [vmem:[%s2899_s1 + $0xa0] sm:$0xff]  ;;  %v2272_v18 = vld [vmem:[%s2899_s1 + $0x98] sm:$0xff]  ;;  %v2271_v22 = vld [vmem:[%s2899_s1 + $0x90] sm:$0xff] }
  0x13   : > { %1421 = vmatpush.bf16.msra.mxu2 %v2275_v6  ;;  %v2281_v15 = vld [vmem:[%s2899_s1 + $0xe0] sm:$0xff]  ;;  %v2280_v19 = vld [vmem:[%s2899_s1 + $0xd8] sm:$0xff]  ;;  %v2279_v23 = vld [vmem:[%s2899_s1 + $0xd0] sm:$0xff] }
  0x14   : > { %1434 = vmatpush.bf16.msra.mxu3 %v2283_v7  ;;  %v2254_v24 = vld [vmem:[%s2899_s1 + $0x8] sm:$0xff]  ;;  %v302_v29 = vld [vmem:[%s2560_s25] sm:$0xff]  ;;  %v2292_v38 = vld [vmem:[%s2899_s1 + $0x138] sm:$0xff] }
  0x15   : > { %1396 = vmatpush.bf16.msra.mxu0 %v2258_v8  ;;  %v2262_v25 = vld [vmem:[%s2899_s1 + $0x48] sm:$0xff]  ;;  %v2253_v30 = vld [vmem:[%s2899_s1] sm:$0xff]  ;;  %v578_v33 = vunpack.c.l.b16 %v302_v29  ;;  %v579_v37 = vunpack.c.h.b16 %v302_v29  ;;  %v2300_v39 = vld [vmem:[%s2899_s1 + $0x178] sm:$0xff] }
  0x16   : > { %1409 = vmatpush.bf16.msra.mxu1 %v2266_v9  ;;  %v2270_v26 = vld [vmem:[%s2899_s1 + $0x88] sm:$0xff]  ;;  %v2261_v31 = vld [vmem:[%s2899_s1 + $0x40] sm:$0xff]  ;;  %v2308_v40 = vld [vmem:[%s2899_s1 + $0x1b8] sm:$0xff] }
  0x17   : > { %1422 = vmatpush.bf16.msra.mxu2 %v2274_v10  ;;  %v2278_v27 = vld [vmem:[%s2899_s1 + $0xc8] sm:$0xff]  ;;  %v2269_v34 = vld [vmem:[%s2899_s1 + $0x80] sm:$0xff]  ;;  %v2316_v41 = vld [vmem:[%s2899_s1 + $0x1f8] sm:$0xff]  ;;  %v594_v43 = vpack.c.b16 %v578_v33, %v578_v33  ;;  %v595_v45 = vpack.c.b16 %v579_v37, %v579_v37 }
  0x18   : > { %1435 = vmatpush.bf16.msra.mxu3 %v2282_v11  ;;  %v303_v28 = vld [vmem:[%s2560_s25 + $0x8] sm:$0xff]  ;;  %v2277_v35 = vld [vmem:[%s2899_s1 + $0xc0] sm:$0xff]  ;;  %v2291_v46 = vld [vmem:[%s2899_s1 + $0x130] sm:$0xff] }
  0x19   : > { %1397 = vmatpush.bf16.msra.mxu0 %v2257_v12  ;;  %v580_v32 = vunpack.c.l.b16 %v303_v28  ;;  %v581_v36 = vunpack.c.h.b16 %v303_v28  ;;  %v2299_v47 = vld [vmem:[%s2899_s1 + $0x170] sm:$0xff]  ;;  %v2290_v50 = vld [vmem:[%s2899_s1 + $0x128] sm:$0xff]  ;;  %v2289_v54 = vld [vmem:[%s2899_s1 + $0x120] sm:$0xff] }
  0x1a   : > { %1410 = vmatpush.bf16.msra.mxu1 %v2265_v13  ;;  %v2307_v48 = vld [vmem:[%s2899_s1 + $0x1b0] sm:$0xff]  ;;  %v2298_v51 = vld [vmem:[%s2899_s1 + $0x168] sm:$0xff]  ;;  %v2297_v55 = vld [vmem:[%s2899_s1 + $0x160] sm:$0xff] }
  0x1b   : > { %1423 = vmatpush.bf16.msra.mxu2 %v2273_v14  ;;  %v596_v42 = vpack.c.b16 %v580_v32, %v580_v32  ;;  %v597_v44 = vpack.c.b16 %v581_v36, %v581_v36  ;;  %v2315_v49 = vld [vmem:[%s2899_s1 + $0x1f0] sm:$0xff]  ;;  %v2306_v52 = vld [vmem:[%s2899_s1 + $0x1a8] sm:$0xff]  ;;  %v2305_v56 = vld [vmem:[%s2899_s1 + $0x1a0] sm:$0xff] }
  0x1c   : > { %1436 = vmatpush.bf16.msra.mxu3 %v2281_v15  ;;  %v2314_v53 = vld [vmem:[%s2899_s1 + $0x1e8] sm:$0xff]  ;;  %v2313_v57 = vld [vmem:[%s2899_s1 + $0x1e0] sm:$0xff]  ;;  %v2288_v58 = vld [vmem:[%s2899_s1 + $0x118] sm:$0xff] }
  0x1d   : > { %1398 = vmatpush.bf16.msra.mxu0 %v2256_v16  ;;  %v2296_v59 = vld [vmem:[%s2899_s1 + $0x158] sm:$0xff]  ;;  %v2287_v62 = vld [vmem:[%s2899_s1 + $0x110] sm:$0xff]  ;;  %v2286_v2 = vld [vmem:[%s2899_s1 + $0x108] sm:$0xff] }
  0x1e   : > { %1411 = vmatpush.bf16.msra.mxu1 %v2264_v17  ;;  %v2304_v60 = vld [vmem:[%s2899_s1 + $0x198] sm:$0xff]  ;;  %v2295_v63 = vld [vmem:[%s2899_s1 + $0x150] sm:$0xff]  ;;  %v2294_v3 = vld [vmem:[%s2899_s1 + $0x148] sm:$0xff] }
  0x1f   : > { %1424 = vmatpush.bf16.msra.mxu2 %v2272_v18  ;;  %v2312_v61 = vld [vmem:[%s2899_s1 + $0x1d8] sm:$0xff]  ;;  %v2303_v0 = vld [vmem:[%s2899_s1 + $0x190] sm:$0xff]  ;;  %v2302_v4 = vld [vmem:[%s2899_s1 + $0x188] sm:$0xff] }
  0x20   : > { %1437 = vmatpush.bf16.msra.mxu3 %v2280_v19  ;;  %v2311_v1 = vld [vmem:[%s2899_s1 + $0x1d0] sm:$0xff]  ;;  %v2310_v5 = vld [vmem:[%s2899_s1 + $0x1c8] sm:$0xff]  ;;  %v305_v6 = vld [vmem:[%s2560_s25 + $0x18] sm:$0xff] }
  0x21   : > { %1399 = vmatpush.bf16.msra.mxu0 %v2255_v20  ;;  %v304_v7 = vld [vmem:[%s2560_s25 + $0x10] sm:$0xff]  ;;  %v2285_v8 = vld [vmem:[%s2899_s1 + $0x100] sm:$0xff]  ;;  %v584_v10 = vunpack.c.l.b16 %v305_v6  ;;  %v585_v14 = vunpack.c.h.b16 %v305_v6  ;;  %v2324_v16 = vld [vmem:[%s2899_s1 + $0x238] sm:$0xff] }
  0x22   : > { %1412 = vmatpush.bf16.msra.mxu1 %v2263_v21  ;;  %v2293_v9 = vld [vmem:[%s2899_s1 + $0x140] sm:$0xff]  ;;  %v582_v11 = vunpack.c.l.b16 %v304_v7  ;;  %v583_v15 = vunpack.c.h.b16 %v304_v7  ;;  %v2332_v17 = vld [vmem:[%s2899_s1 + $0x278] sm:$0xff]  ;;  %v2322_v28 = vld [vmem:[%s2899_s1 + $0x228] sm:$0xff] }
  0x23   : > { %1425 = vmatpush.bf16.msra.mxu2 %v2271_v22  ;;  %v2301_v12 = vld [vmem:[%s2899_s1 + $0x180] sm:$0xff]  ;;  %v2340_v18 = vld [vmem:[%s2899_s1 + $0x2b8] sm:$0xff]  ;;  %v600_v20 = vpack.c.b16 %v584_v10, %v584_v10  ;;  %v601_v22 = vpack.c.b16 %v585_v14, %v585_v14  ;;  %v2330_v29 = vld [vmem:[%s2899_s1 + $0x268] sm:$0xff] }
  0x24   : > { %1438 = vmatpush.bf16.msra.mxu3 %v2279_v23  ;;  %v2309_v13 = vld [vmem:[%s2899_s1 + $0x1c0] sm:$0xff]  ;;  %v2348_v19 = vld [vmem:[%s2899_s1 + $0x2f8] sm:$0xff]  ;;  %v598_v21 = vpack.c.b16 %v582_v11, %v582_v11  ;;  %v599_v23 = vpack.c.b16 %v583_v15, %v583_v15  ;;  %v2354_v6 = vld [vmem:[%s2899_s1 + $0x328] sm:$0xff] }
  0x25   : > { %1400 = vmatpush.bf16.msra.mxu0 %v2254_v24  ;;  %v2323_v24 = vld [vmem:[%s2899_s1 + $0x230] sm:$0xff]  ;;  %v2321_v32 = vld [vmem:[%s2899_s1 + $0x220] sm:$0xff]  ;;  %v2320_v36 = vld [vmem:[%s2899_s1 + $0x218] sm:$0xff] }
  0x26   : > { %1413 = vmatpush.bf16.msra.mxu1 %v2262_v25  ;;  %v2331_v25 = vld [vmem:[%s2899_s1 + $0x270] sm:$0xff]  ;;  %v2329_v33 = vld [vmem:[%s2899_s1 + $0x260] sm:$0xff]  ;;  %v2328_v37 = vld [vmem:[%s2899_s1 + $0x258] sm:$0xff] }
  0x27   : > { %1426 = vmatpush.bf16.msra.mxu2 %v2270_v26  ;;  %v2339_v26 = vld [vmem:[%s2899_s1 + $0x2b0] sm:$0xff]  ;;  %v2362_v7 = vld [vmem:[%s2899_s1 + $0x368] sm:$0xff]  ;;  %v2353_v10 = vld [vmem:[%s2899_s1 + $0x320] sm:$0xff] }
  0x28   : > { %1439 = vmatpush.bf16.msra.mxu3 %v2278_v27  ;;  %v2347_v27 = vld [vmem:[%s2899_s1 + $0x2f0] sm:$0xff]  ;;  %v2361_v11 = vld [vmem:[%s2899_s1 + $0x360] sm:$0xff]  ;;  %v2352_v14 = vld [vmem:[%s2899_s1 + $0x318] sm:$0xff] }
  0x29   : > { %1401 = vmatpush.bf16.msra.mxu0 %v2253_v30  ;;  %v2338_v30 = vld [vmem:[%s2899_s1 + $0x2a8] sm:$0xff]  ;;  %v2360_v15 = vld [vmem:[%s2899_s1 + $0x358] sm:$0xff] }
  0x2a   : > { %1414 = vmatpush.bf16.msra.mxu1 %v2261_v31  ;;  %v2346_v31 = vld [vmem:[%s2899_s1 + $0x2e8] sm:$0xff] }
  0x2b   : > { %1427 = vmatpush.bf16.msra.mxu2 %v2269_v34  ;;  %v2337_v34 = vld [vmem:[%s2899_s1 + $0x2a0] sm:$0xff] }
  0x2c   : > { %1440 = vmatpush.bf16.msra.mxu3 %v2277_v35  ;;  %1402 = vmatmul.bf16.vlgmr.msra.gmra.mxu0 %v594_v43  ;;  %v2345_v35 = vld [vmem:[%s2899_s1 + $0x2e0] sm:$0xff]  ;;  %v2343_v43 = vld [vmem:[%s2899_s1 + $0x2d0] sm:$0xff] }
  0x2d   : > { %1446 = vmatpush.bf16.msrb.mxu0 %v2292_v38  ;;  %1415 = vmatmul.bf16.vlgmr.msra.gmra.mxu1 %v595_v45  ;;  %v2336_v38 = vld [vmem:[%s2899_s1 + $0x298] sm:$0xff]  ;;  %v2326_v45 = vld [vmem:[%s2899_s1 + $0x248] sm:$0xff] }
  0x2e   : > { %1459 = vmatpush.bf16.msrb.mxu1 %v2300_v39  ;;  %1428 = vmatmul.bf16.vlgmr.msra.gmra.mxu2 %v596_v42  ;;  %v2344_v39 = vld [vmem:[%s2899_s1 + $0x2d8] sm:$0xff]  ;;  %v2335_v42 = vld [vmem:[%s2899_s1 + $0x290] sm:$0xff] }
  0x2f   : > { %1472 = vmatpush.bf16.msrb.mxu2 %v2308_v40  ;;  %1441 = vmatmul.bf16.vlgmr.msra.gmra.mxu3 %v597_v44  ;;  %v2319_v40 = vld [vmem:[%s2899_s1 + $0x210] sm:$0xff]  ;;  %v2318_v44 = vld [vmem:[%s2899_s1 + $0x208] sm:$0xff] }
  0x30   : > { %1485 = vmatpush.bf16.msrb.mxu3 %v2316_v41  ;;  %v2327_v41 = vld [vmem:[%s2899_s1 + $0x250] sm:$0xff] }
  0x31   : > { %1447 = vmatpush.bf16.msrb.mxu0 %v2291_v46  ;;  %v2334_v46 = vld [vmem:[%s2899_s1 + $0x288] sm:$0xff] }
  0x32   : > { %1460 = vmatpush.bf16.msrb.mxu1 %v2299_v47  ;;  %v2342_v47 = vld [vmem:[%s2899_s1 + $0x2c8] sm:$0xff] }
  0x33   : > { %1473 = vmatpush.bf16.msrb.mxu2 %v2307_v48  ;;  %v306_v48 = vld [vmem:[%s2560_s25 + $0x20] sm:$0xff] }
  0x34   : > { %1486 = vmatpush.bf16.msrb.mxu3 %v2315_v49  ;;  %v307_v49 = vld [vmem:[%s2560_s25 + $0x28] sm:$0xff] }
  0x35   : > { %1448 = vmatpush.bf16.msrb.mxu0 %v2290_v50  ;;  %v2317_v50 = vld [vmem:[%s2899_s1 + $0x200] sm:$0xff] }
  0x36   : > { %1461 = vmatpush.bf16.msrb.mxu1 %v2298_v51  ;;  %v2325_v51 = vld [vmem:[%s2899_s1 + $0x240] sm:$0xff] }
  0x37   : > { %1474 = vmatpush.bf16.msrb.mxu2 %v2306_v52  ;;  %v586_v52 = vunpack.c.l.b16 %v306_v48 }
  0x38   : > { %1487 = vmatpush.bf16.msrb.mxu3 %v2314_v53  ;;  %v588_v53 = vunpack.c.l.b16 %v307_v49 }
  0x39   : > { %1449 = vmatpush.bf16.msrb.mxu0 %v2289_v54  ;;  %v2333_v54 = vld [vmem:[%s2899_s1 + $0x280] sm:$0xff] }
  0x3a   : > { %1462 = vmatpush.bf16.msrb.mxu1 %v2297_v55  ;;  %v2341_v55 = vld [vmem:[%s2899_s1 + $0x2c0] sm:$0xff] }
  0x3b   : > { %1475 = vmatpush.bf16.msrb.mxu2 %v2305_v56  ;;  %v587_v56 = vunpack.c.h.b16 %v306_v48 }
  0x3c   : > { %1488 = vmatpush.bf16.msrb.mxu3 %v2313_v57  ;;  %v589_v57 = vunpack.c.h.b16 %v307_v49 }
  0x3d   : > { %1450 = vmatpush.bf16.msrb.mxu0 %v2288_v58  ;;  %v2356_v58 = vld [vmem:[%s2899_s1 + $0x338] sm:$0xff] }
  0x3e   : > { %1463 = vmatpush.bf16.msrb.mxu1 %v2296_v59  ;;  %v2364_v59 = vld [vmem:[%s2899_s1 + $0x378] sm:$0xff] }
  0x3f   : > { %1476 = vmatpush.bf16.msrb.mxu2 %v2304_v60  ;;  %v2372_v60 = vld [vmem:[%s2899_s1 + $0x3b8] sm:$0xff] }
  0x40   : > { %1489 = vmatpush.bf16.msrb.mxu3 %v2312_v61  ;;  %v2380_v61 = vld [vmem:[%s2899_s1 + $0x3f8] sm:$0xff] }
  0x41   : > { %1451 = vmatpush.bf16.msrb.mxu0 %v2287_v62  ;;  %v602_v62 = vpack.c.b16 %v586_v52, %v586_v52 }
  0x42   : > { %1464 = vmatpush.bf16.msrb.mxu1 %v2295_v63  ;;  %v604_v63 = vpack.c.b16 %v588_v53, %v588_v53 }
  0x43   : > { %1477 = vmatpush.bf16.msrb.mxu2 %v2303_v0  ;;  %v603_v0 = vpack.c.b16 %v587_v56, %v587_v56 }
  0x44   : > { %1490 = vmatpush.bf16.msrb.mxu3 %v2311_v1  ;;  %v605_v1 = vpack.c.b16 %v589_v57, %v589_v57 }
  0x45   : > { %1452 = vmatpush.bf16.msrb.mxu0 %v2286_v2  ;;  %v2355_v2 = vld [vmem:[%s2899_s1 + $0x330] sm:$0xff] }
  0x46   : > { %1465 = vmatpush.bf16.msrb.mxu1 %v2294_v3  ;;  %v2363_v3 = vld [vmem:[%s2899_s1 + $0x370] sm:$0xff] }
  0x47   : > { %1478 = vmatpush.bf16.msrb.mxu2 %v2302_v4  ;;  %v2371_v4 = vld [vmem:[%s2899_s1 + $0x3b0] sm:$0xff] }
  0x48   : > { %1491 = vmatpush.bf16.msrb.mxu3 %v2310_v5  ;;  %v2379_v5 = vld [vmem:[%s2899_s1 + $0x3f0] sm:$0xff] }
  0x49   : > { %1453 = vmatpush.bf16.msrb.mxu0 %v2285_v8  ;;  %v2370_v8 = vld [vmem:[%s2899_s1 + $0x3a8] sm:$0xff] }
  0x4a   : > { %1466 = vmatpush.bf16.msrb.mxu1 %v2293_v9  ;;  %v2378_v9 = vld [vmem:[%s2899_s1 + $0x3e8] sm:$0xff] }
  0x4b   : > { %1479 = vmatpush.bf16.msrb.mxu2 %v2301_v12  ;;  %v2369_v12 = vld [vmem:[%s2899_s1 + $0x3a0] sm:$0xff] }
  0x4c   : > { %1492 = vmatpush.bf16.msrb.mxu3 %v2309_v13  ;;  %1454 = vmatmul.bf16.vlgmr.msrb.gmra.mxu0 %v598_v21  ;;  %v2377_v13 = vld [vmem:[%s2899_s1 + $0x3e0] sm:$0xff]  ;;  %v2375_v21 = vld [vmem:[%s2899_s1 + $0x3d0] sm:$0xff] }
  0x4d   : > { %1498 = vmatpush.bf16.msra.mxu0 %v2324_v16  ;;  %1467 = vmatmul.bf16.vlgmr.msrb.gmra.mxu1 %v599_v23  ;;  %v2368_v16 = vld [vmem:[%s2899_s1 + $0x398] sm:$0xff]  ;;  %v2358_v23 = vld [vmem:[%s2899_s1 + $0x348] sm:$0xff] }
  0x4e   : > { %1511 = vmatpush.bf16.msra.mxu1 %v2332_v17  ;;  %1480 = vmatmul.bf16.vlgmr.msrb.gmra.mxu2 %v600_v20  ;;  %v2376_v17 = vld [vmem:[%s2899_s1 + $0x3d8] sm:$0xff]  ;;  %v2367_v20 = vld [vmem:[%s2899_s1 + $0x390] sm:$0xff] }
  0x4f   : > { %1524 = vmatpush.bf16.msra.mxu2 %v2340_v18  ;;  %1493 = vmatmul.bf16.vlgmr.msrb.gmra.mxu3 %v601_v22  ;;  %v2351_v18 = vld [vmem:[%s2899_s1 + $0x310] sm:$0xff]  ;;  %v2350_v22 = vld [vmem:[%s2899_s1 + $0x308] sm:$0xff] }
  0x50   : > { %1537 = vmatpush.bf16.msra.mxu3 %v2348_v19  ;;  %v2359_v19 = vld [vmem:[%s2899_s1 + $0x350] sm:$0xff] }
  0x51   : > { %1499 = vmatpush.bf16.msra.mxu0 %v2323_v24  ;;  %v308_v24 = vld [vmem:[%s2560_s25 + $0x30] sm:$0xff] }
  0x52   : > { %1512 = vmatpush.bf16.msra.mxu1 %v2331_v25  ;;  %v2366_v25 = vld [vmem:[%s2899_s1 + $0x388] sm:$0xff] }
  0x53   : > { %1525 = vmatpush.bf16.msra.mxu2 %v2339_v26  ;;  %v2374_v26 = vld [vmem:[%s2899_s1 + $0x3c8] sm:$0xff] }
  0x54   : > { %1538 = vmatpush.bf16.msra.mxu3 %v2347_v27  ;;  %v309_v27 = vld [vmem:[%s2560_s25 + $0x38] sm:$0xff] }
  0x55   : > { %1500 = vmatpush.bf16.msra.mxu0 %v2322_v28  ;;  %v590_v28 = vunpack.c.l.b16 %v308_v24 }
  0x56   : > { %1513 = vmatpush.bf16.msra.mxu1 %v2330_v29  ;;  %v591_v29 = vunpack.c.h.b16 %v308_v24 }
  0x57   : > { %1526 = vmatpush.bf16.msra.mxu2 %v2338_v30  ;;  %v2349_v30 = vld [vmem:[%s2899_s1 + $0x300] sm:$0xff] }
  0x58   : > { %1539 = vmatpush.bf16.msra.mxu3 %v2346_v31  ;;  %v2357_v31 = vld [vmem:[%s2899_s1 + $0x340] sm:$0xff] }
  0x59   : > { %1501 = vmatpush.bf16.msra.mxu0 %v2321_v32  ;;  %v592_v32 = vunpack.c.l.b16 %v309_v27 }
  0x5a   : > { %1514 = vmatpush.bf16.msra.mxu1 %v2329_v33  ;;  %v593_v33 = vunpack.c.h.b16 %v309_v27 }
  0x5b   : > { %1527 = vmatpush.bf16.msra.mxu2 %v2337_v34  ;;  %v2365_v34 = vld [vmem:[%s2899_s1 + $0x380] sm:$0xff] }
  0x5c   : > { %1540 = vmatpush.bf16.msra.mxu3 %v2345_v35  ;;  %v2373_v35 = vld [vmem:[%s2899_s1 + $0x3c0] sm:$0xff] }
  0x5d   : > { %1502 = vmatpush.bf16.msra.mxu0 %v2320_v36  ;;  %v606_v36 = vpack.c.b16 %v590_v28, %v590_v28 }
  0x5e   : > { %1515 = vmatpush.bf16.msra.mxu1 %v2328_v37  ;;  %v607_v37 = vpack.c.b16 %v591_v29, %v591_v29 }
  0x5f   : > { %1528 = vmatpush.bf16.msra.mxu2 %v2336_v38  ;;  %v608_v38 = vpack.c.b16 %v592_v32, %v592_v32 }
  0x60   : > { %1541 = vmatpush.bf16.msra.mxu3 %v2344_v39  ;;  %v609_v39 = vpack.c.b16 %v593_v33, %v593_v33 }
  0x61   : > { %1503 = vmatpush.bf16.msra.mxu0 %v2319_v40  ;;  %v2405_v40 = vld [vmem:[%s2900_s2] ss:$0 sm:$0xff] }
  0x62   : > { %1516 = vmatpush.bf16.msra.mxu1 %v2327_v41 }
  0x63   : > { %1529 = vmatpush.bf16.msra.mxu2 %v2335_v42 }
  0x64   : > { %1542 = vmatpush.bf16.msra.mxu3 %v2343_v43 }
  0x65   : > { %1504 = vmatpush.bf16.msra.mxu0 %v2318_v44 }
  0x66   : > { %1517 = vmatpush.bf16.msra.mxu1 %v2326_v45 }
  0x67   : > { %1530 = vmatpush.bf16.msra.mxu2 %v2334_v46 }
  0x68   : > { %1543 = vmatpush.bf16.msra.mxu3 %v2342_v47 }
  0x69   : > { %1505 = vmatpush.bf16.msra.mxu0 %v2317_v50 }
  0x6a   : > { %1518 = vmatpush.bf16.msra.mxu1 %v2325_v51 }
  0x6b   : > { %1531 = vmatpush.bf16.msra.mxu2 %v2333_v54 }
  0x6c   : > { %1544 = vmatpush.bf16.msra.mxu3 %v2341_v55  ;;  %1506 = vmatmul.bf16.vlgmr.msra.gmra.mxu0 %v602_v62 }
  0x6d   : > { %1550 = vmatpush.bf16.msrb.mxu0 %v2356_v58  ;;  %1519 = vmatmul.bf16.vlgmr.msra.gmra.mxu1 %v603_v0 }
  0x6e   : > { %1563 = vmatpush.bf16.msrb.mxu1 %v2364_v59  ;;  %1532 = vmatmul.bf16.vlgmr.msra.gmra.mxu2 %v604_v63 }
  0x6f   : > { %1576 = vmatpush.bf16.msrb.mxu2 %v2372_v60  ;;  %1545 = vmatmul.bf16.vlgmr.msra.gmra.mxu3 %v605_v1 }
  0x70   : > { %1589 = vmatpush.bf16.msrb.mxu3 %v2380_v61 }
  0x71   : > { %1551 = vmatpush.bf16.msrb.mxu0 %v2355_v2 }
  0x72   : > { %1564 = vmatpush.bf16.msrb.mxu1 %v2363_v3 }
  0x73   : > { %1577 = vmatpush.bf16.msrb.mxu2 %v2371_v4 }
  0x74   : > { %1590 = vmatpush.bf16.msrb.mxu3 %v2379_v5 }
  0x75   : > { %1552 = vmatpush.bf16.msrb.mxu0 %v2354_v6 }
  0x76   : > { %1565 = vmatpush.bf16.msrb.mxu1 %v2362_v7 }
  0x77   : > { %1578 = vmatpush.bf16.msrb.mxu2 %v2370_v8 }
  0x78   : > { %1591 = vmatpush.bf16.msrb.mxu3 %v2378_v9 }
  0x79   : > { %1553 = vmatpush.bf16.msrb.mxu0 %v2353_v10 }
  0x7a   : > { %1566 = vmatpush.bf16.msrb.mxu1 %v2361_v11 }
  0x7b   : > { %1579 = vmatpush.bf16.msrb.mxu2 %v2369_v12 }
  0x7c   : > { %1592 = vmatpush.bf16.msrb.mxu3 %v2377_v13 }
  0x7d   : > { %1554 = vmatpush.bf16.msrb.mxu0 %v2352_v14 }
  0x7e   : > { %1567 = vmatpush.bf16.msrb.mxu1 %v2360_v15 }
  0x7f   : > { %1580 = vmatpush.bf16.msrb.mxu2 %v2368_v16 }
  0x80   : > { %1593 = vmatpush.bf16.msrb.mxu3 %v2376_v17 }
  0x81   : > { %1555 = vmatpush.bf16.msrb.mxu0 %v2351_v18 }
  0x82   : > { %1568 = vmatpush.bf16.msrb.mxu1 %v2359_v19 }
  0x83   : > { %1581 = vmatpush.bf16.msrb.mxu2 %v2367_v20 }
  0x84   : > { %1594 = vmatpush.bf16.msrb.mxu3 %v2375_v21 }
  0x85   : > { %1556 = vmatpush.bf16.msrb.mxu0 %v2350_v22 }
  0x86   : > { %1569 = vmatpush.bf16.msrb.mxu1 %v2358_v23 }
  0x87   : > { %1582 = vmatpush.bf16.msrb.mxu2 %v2366_v25 }
  0x88   : > { %1595 = vmatpush.bf16.msrb.mxu3 %v2374_v26 }
  0x89   : > { %1557 = vmatpush.bf16.msrb.mxu0 %v2349_v30 }
  0x8a   : > { %1570 = vmatpush.bf16.msrb.mxu1 %v2357_v31 }
  0x8b   : > { %1583 = vmatpush.bf16.msrb.mxu2 %v2365_v34 }
  0x8c   : > { %1596 = vmatpush.bf16.msrb.mxu3 %v2373_v35  ;;  %1558 = vmatmul.bf16.vlgmr.msrb.gmra.mxu0 %v606_v36 }
  0x8d   : > { %1571 = vmatmul.bf16.vlgmr.msrb.gmra.mxu1 %v607_v37 }
  0x8e   : > { %1584 = vmatmul.bf16.vlgmr.msrb.gmra.mxu2 %v608_v38 }
  0x8f   : > { %1597 = vmatmul.bf16.vlgmr.msrb.gmra.mxu3 %v609_v39 }
  0xa9   : > { %v1403_v41 = vpop.f32.mrf.mxu0 }
  0xaa   : > { %v1404_v42 = vadd.f32 %v2405_v40, %v1403_v41  ;;  %v1416_v43 = vpop.f32.mrf.mxu1 }
  0xac   : > { %v1417_v44 = vadd.f32 %v1416_v43, %v1404_v42 }
  0xb1   : > { %v1429_v45 = vpop.f32.mrf.mxu2  ;;  %v1405_v48 = vpop.f32.mrf.mxu0 }
  0xb2   : > { %v1430_v46 = vadd.f32 %v1429_v45, %v1417_v44  ;;  %v1442_v47 = vpop.f32.mrf.mxu3  ;;  %v1418_v50 = vpop.f32.mrf.mxu1 }
  0xb4   : > { %v1443_v49 = vadd.f32 %v1442_v47, %v1430_v46 }
  0xb9   : > { %v1431_v51 = vpop.f32.mrf.mxu2 }
  0xba   : > { %v1444_v52 = vpop.f32.mrf.mxu3 }
  0xc9   : > { %v1455_v53 = vpop.f32.mrf.mxu0 }
  0xca   : > { %v1468_v54 = vpop.f32.mrf.mxu1  ;;  %v1456_v63 = vadd.f32 %v1455_v53, %v1443_v49 }
  0xcc   : > { %v1469_v3 = vadd.f32 %v1468_v54, %v1456_v63 }
  0xd1   : > { %v1481_v55 = vpop.f32.mrf.mxu2  ;;  %v1457_v57 = vpop.f32.mrf.mxu0 }
  0xd2   : > { %v1494_v56 = vpop.f32.mrf.mxu3  ;;  %v1470_v58 = vpop.f32.mrf.mxu1  ;;  %v1482_v5 = vadd.f32 %v1481_v55, %v1469_v3 }
  0xd4   : > { %v1495_v8 = vadd.f32 %v1494_v56, %v1482_v5 }
  0xd9   : > { %v1483_v59 = vpop.f32.mrf.mxu2 }
  0xda   : > { %v1496_v60 = vpop.f32.mrf.mxu3 }
  0xe9   : > { %v1507_v61 = vpop.f32.mrf.mxu0 }
  0xea   : > { %v1520_v62 = vpop.f32.mrf.mxu1  ;;  %v1508_v9 = vadd.f32 %v1507_v61, %v1495_v8 }
  0xec   : > { %v1521_v10 = vadd.f32 %v1520_v62, %v1508_v9 }
  0xf1   : > { %v1533_v0 = vpop.f32.mrf.mxu2  ;;  %v1509_v2 = vpop.f32.mrf.mxu0 }
  0xf2   : > { %v1546_v1 = vpop.f32.mrf.mxu3  ;;  %v1522_v4 = vpop.f32.mrf.mxu1  ;;  %v1534_v11 = vadd.f32 %v1533_v0, %v1521_v10 }
  0xf4   : > { %v1547_v12 = vadd.f32 %v1546_v1, %v1534_v11 }
  0xf9   : > { %v1535_v6 = vpop.f32.mrf.mxu2 }
  0xfa   : > { %v1548_v7 = vpop.f32.mrf.mxu3 }
 0x109   : > { %v1559_v13 = vpop.f32.mrf.mxu0 }
 0x10a   : > { %v1572_v14 = vpop.f32.mrf.mxu1  ;;  %v1560_v15 = vadd.f32 %v1559_v13, %v1547_v12 }
 0x10c   : > { %v1573_v16 = vadd.f32 %v1572_v14, %v1560_v15 }
 0x111   : > { %v1585_v17 = vpop.f32.mrf.mxu2  ;;  %v1561_v20 = vpop.f32.mrf.mxu0 }
 0x112   : > { %v1598_v18 = vpop.f32.mrf.mxu3  ;;  %v1586_v19 = vadd.f32 %v1585_v17, %v1573_v16  ;;  %v1574_v21 = vpop.f32.mrf.mxu1 }
 0x114   : > { %v1599_v22 = vadd.f32 %v1598_v18, %v1586_v19 }
 0x116   : > { %1602 = vst [vmem:[%s301_s15] sm:$0xff] %v1599_v22 }
 0x119   : > { %v1587_v23 = vpop.f32.mrf.mxu2 }
 0x11a   : > { %v1600_v24 = vpop.f32.mrf.mxu3 }
 0x11b PF: > { %s15_s20 = sadd.s32 1, %s2428_s20   ;;  %s2904_s18 = smov %s2424_s19 }
 0x11c   : > { %p12_p5 = scmp.ge.s32.totalorder %s15_s20, 4   ;;  %s2905_s19 = smov %s2907_s3 }
 0x11e   :  { %14 = sbr.rel (!%p12_p5) target bundleno = 2 (0x2), region = 82 }

</bundles_post_ra>
